<compile_context>
chip_gen: v7x
topology: tpu7x:2x2x1
jax: 0.10.0
libtpu: 0.0.40
codegen_flags: <defaults>
</compile_context>

<pallas_src>
import functools

import jax
import jax.numpy as jnp
from jax.experimental import pallas as pl
from jax.experimental.pallas import tpu as pltpu

_LANES = 128
_SUBLANES = 8


def _round_up(x, m):
    return (x + m - 1) // m * m


def ventas_mlp_kernel(x_ref, p_ref, o_ref, *, in_features, hidden_size, out_features):
    """Fused Linear -> ReLU -> Linear on one lane-dense batch tile.

    x_ref : VMEM (in_features, rb, 128) f32  -- feature-major, batch on (sublane, lane)
    p_ref : SMEM (P,) f32 flat params:
              [0, in*H)              W1 row-major  (W1[k, j] at k*H + j)
              [in*H, in*H + H)       b1
              [.., .. + H*out)       W2 row-major  (W2[j, m] at j*out + m)
              [.., .. + out)         b2
    o_ref : VMEM (out_features, rb, 128) f32
    """
    b1_off = in_features * hidden_size
    w2_off = b1_off + hidden_size
    b2_off = w2_off + hidden_size * out_features

    xs = [x_ref[k] for k in range(in_features)]           # each (rb, 128), dense

    # Initialize each output plane with its bias (scalar splat from SMEM).
    accs = [jnp.zeros_like(xs[0]) + p_ref[b2_off + m] for m in range(out_features)]

    # Unrolled over hidden units: dense (rb, 128) VPU work with scalar weights
    # splatted from SMEM.  MXU intentionally unused (K=in, N=out are tiny).
    for j in range(hidden_size):
        h = xs[0] * p_ref[j] + p_ref[b1_off + j]
        for k in range(1, in_features):
            h = h + xs[k] * p_ref[k * hidden_size + j]
        h = jnp.maximum(h, 0.0)
        for m in range(out_features):
            accs[m] = accs[m] + h * p_ref[w2_off + j * out_features + m]

    for m in range(out_features):
        o_ref[m] = accs[m].astype(o_ref.dtype)


def pack_params(w1, b1, w2, b2):
    """Flatten (W1, b1, W2, b2) into one f32 vector for SMEM scalar reads.

    Note: when the weights are traced jit arguments this concatenation runs
    on-device every call.  It is a few hundred bytes so the cost is noise, but
    if the weights are reused across many calls, pack once outside jit and
    pass the packed vector in directly.
    """
    return jnp.concatenate([
        w1.astype(jnp.float32).reshape(-1),
        b1.astype(jnp.float32).reshape(-1),
        w2.astype(jnp.float32).reshape(-1),
        b2.astype(jnp.float32).reshape(-1),
    ])


@functools.partial(jax.jit, static_argnames=("block_rows",))
def ventas_nn_forward(x, w1, b1, w2, b2, *, block_rows=1024):
    """x: (B, in); w1: (in, H); b1: (1, H)/(H,); w2: (H, out); b2: (1, out)/(out,).

    Returns (B, out) f32.  `block_rows` is the batch-tile size in units of 128
    samples (default moves 1024*128 = 131072 samples = 2 MiB of x per step).
    """
    B, in_f = x.shape
    hidden = w1.shape[1]
    out_f = w2.shape[1]
    assert w1.shape[0] == in_f and w2.shape[0] == hidden
    assert block_rows >= _SUBLANES and block_rows % _SUBLANES == 0, (
        "block_rows must be a positive multiple of 8")

    p = pack_params(w1, b1, w2, b2)

    # Put the batch on (sublane, lane): pad B only to the next multiple of 128
    # (tiny; fused with the transpose), transpose feature-major, and view as
    # (in, nb, 128).  The reshape after the transpose is layout-free.
    b128 = max(_LANES, _round_up(B, _LANES))
    nb = b128 // _LANES
    if b128 != B:
        x = jnp.pad(x, ((0, b128 - B), (0, 0)))
    x3 = x.astype(jnp.float32).T.reshape(in_f, nb, _LANES)

    # Tile the row axis: rb is either the full extent (small B) or a multiple
    # of 8; for large batches keep >= ~8 tiles so both v7x TensorCores get
    # work without shrinking tiles below block_rows needlessly.
    if nb <= block_rows:
        rb = nb
    else:
        rb = min(block_rows, _round_up(pl.cdiv(nb, 8), _SUBLANES))
    grid = (pl.cdiv(nb, rb),)

    kernel = functools.partial(
        ventas_mlp_kernel,
        in_features=in_f,
        hidden_size=hidden,
        out_features=out_f,
    )

    y3 = pl.pallas_call(
        kernel,
        out_shape=jax.ShapeDtypeStruct((out_f, nb, _LANES), jnp.float32),
        grid=grid,
        in_specs=[
            pl.BlockSpec((in_f, rb, _LANES), lambda i: (0, i, 0)),
            pl.BlockSpec(memory_space=pltpu.MemorySpace.SMEM),  # whole param vector
        ],
        out_specs=pl.BlockSpec((out_f, rb, _LANES), lambda i: (0, i, 0)),
        compiler_params=pltpu.CompilerParams(dimension_semantics=("parallel",)),
    )(x3, p)

    # Lane-dense result -> (out, B) via a free reshape, then back to (B, out).
    y = y3.reshape(out_f, nb * _LANES)[:, :B]
    return y.T


def init_params(key, input_size, hidden_size, output_size):
    """Deterministic init mimicking nn.Linear (uniform +/- 1/sqrt(fan_in))."""
    k1, k2, k3, k4 = jax.random.split(key, 4)
    bound1 = 1.0 / jnp.sqrt(jnp.float32(input_size))
    bound2 = 1.0 / jnp.sqrt(jnp.float32(hidden_size))
    w1 = jax.random.uniform(k1, (input_size, hidden_size), jnp.float32, -bound1, bound1)
    b1 = jax.random.uniform(k2, (1, hidden_size), jnp.float32, -bound1, bound1)
    w2 = jax.random.uniform(k3, (hidden_size, output_size), jnp.float32, -bound2, bound2)
    b2 = jax.random.uniform(k4, (1, output_size), jnp.float32, -bound2, bound2)
    return w1, b1, w2, b2


def _reference(x, w1, b1, w2, b2):
    h = jnp.maximum(
        jnp.dot(x, w1, precision=jax.lax.Precision.HIGHEST) + b1.reshape(1, -1), 0.0)
    return jnp.dot(h, w2, precision=jax.lax.Precision.HIGHEST) + b2.reshape(1, -1)


if __name__ == "__main__":
    # Small shapes consistent with VentasNN: a sales-regression MLP.
    input_size, hidden_size, output_size = 4, 32, 1

    key = jax.random.PRNGKey(0)
    kx, kp, kx2 = jax.random.split(key, 3)
    w1, b1, w2, b2 = init_params(kp, input_size, hidden_size, output_size)

    # Small demo batch (single grid tile, partially used lanes).
    x = jax.random.normal(kx, (8, input_size), jnp.float32)
    y = ventas_nn_forward(x, w1, b1, w2, b2)
    jax.block_until_ready(y)
    ref = _reference(x, w1, b1, w2, b2)
    assert y.shape == (8, output_size)
    assert jnp.allclose(y, ref, atol=1e-5, rtol=1e-5)

    # Larger batch exercising a multi-step grid with a ragged last block
    # (B=2500 -> nb=20 rows of 128 samples, rb=8 -> grid=3).
    x_big = jax.random.normal(kx2, (2500, input_size), jnp.float32)
    y_big = ventas_nn_forward(x_big, w1, b1, w2, b2, block_rows=8)
    jax.block_until_ready(y_big)
    ref_big = _reference(x_big, w1, b1, w2, b2)
    assert y_big.shape == (2500, output_size)
    assert jnp.allclose(y_big, ref_big, atol=1e-5, rtol=1e-5)

    print("KERNEL_OK")
</pallas_src>

<mosaic_0001>
module attributes {stable_mosaic.version = 11 : i64} {
  func.func @ventas_mlp_kernel(%arg0: i32, %arg1: memref<4x1x128xf32, #tpu.memory_space<vmem>>, %arg2: memref<193xf32, #tpu.memory_space<smem>>, %arg3: memref<1x1x128xf32, #tpu.memory_space<vmem>>) attributes {dimension_semantics = [#tpu.dimension_semantics<parallel>], iteration_bounds = array<i64: 1>, scalar_prefetch = 0 : i64, scratch_operands = 0 : i64, tpu.core_type = #tpu.core_type<tc>, window_params = [{transform_indices = @transform_0, window_bounds = array<i64: 4, 1, 128>}, {transform_indices = @transform_1, window_bounds = array<i64: 193>}, {transform_indices = @transform_2, window_bounds = array<i64: 1, 1, 128>}]} {
    %c0 = arith.constant 0 : index
    %c0_0 = arith.constant 0 : index
    %c0_1 = arith.constant 0 : index
    %0 = vector.load %arg1[%c0, %c0_0, %c0_1] : memref<4x1x128xf32, #tpu.memory_space<vmem>>, vector<1x1x128xf32>
    %1 = vector.shape_cast %0 : vector<1x1x128xf32> to vector<1x128xf32>
    %c1 = arith.constant 1 : index
    %c0_2 = arith.constant 0 : index
    %c0_3 = arith.constant 0 : index
    %2 = vector.load %arg1[%c1, %c0_2, %c0_3] : memref<4x1x128xf32, #tpu.memory_space<vmem>>, vector<1x1x128xf32>
    %3 = vector.shape_cast %2 : vector<1x1x128xf32> to vector<1x128xf32>
    %c2 = arith.constant 2 : index
    %c0_4 = arith.constant 0 : index
    %c0_5 = arith.constant 0 : index
    %4 = vector.load %arg1[%c2, %c0_4, %c0_5] : memref<4x1x128xf32, #tpu.memory_space<vmem>>, vector<1x1x128xf32>
    %5 = vector.shape_cast %4 : vector<1x1x128xf32> to vector<1x128xf32>
    %c3 = arith.constant 3 : index
    %c0_6 = arith.constant 0 : index
    %c0_7 = arith.constant 0 : index
    %6 = vector.load %arg1[%c3, %c0_6, %c0_7] : memref<4x1x128xf32, #tpu.memory_space<vmem>>, vector<1x1x128xf32>
    %7 = vector.shape_cast %6 : vector<1x1x128xf32> to vector<1x128xf32>
    %cst = arith.constant 0.000000e+00 : f32
    %8 = vector.broadcast %cst : f32 to vector<1x128xf32>
    %c192 = arith.constant 192 : index
    %9 = memref.load %arg2[%c192] : memref<193xf32, #tpu.memory_space<smem>>
    %10 = vector.broadcast %9 : f32 to vector<1x128xf32>
    %11 = arith.addf %8, %10 : vector<1x128xf32>
    %c0_8 = arith.constant 0 : index
    %12 = memref.load %arg2[%c0_8] : memref<193xf32, #tpu.memory_space<smem>>
    %13 = vector.broadcast %12 : f32 to vector<1x128xf32>
    %14 = arith.mulf %1, %13 : vector<1x128xf32>
    %c128 = arith.constant 128 : index
    %15 = memref.load %arg2[%c128] : memref<193xf32, #tpu.memory_space<smem>>
    %16 = vector.broadcast %15 : f32 to vector<1x128xf32>
    %17 = arith.addf %14, %16 : vector<1x128xf32>
    %c32 = arith.constant 32 : index
    %18 = memref.load %arg2[%c32] : memref<193xf32, #tpu.memory_space<smem>>
    %19 = vector.broadcast %18 : f32 to vector<1x128xf32>
    %20 = arith.mulf %3, %19 : vector<1x128xf32>
    %21 = arith.addf %17, %20 : vector<1x128xf32>
    %c64 = arith.constant 64 : index
    %22 = memref.load %arg2[%c64] : memref<193xf32, #tpu.memory_space<smem>>
    %23 = vector.broadcast %22 : f32 to vector<1x128xf32>
    %24 = arith.mulf %5, %23 : vector<1x128xf32>
    %25 = arith.addf %21, %24 : vector<1x128xf32>
    %c96 = arith.constant 96 : index
    %26 = memref.load %arg2[%c96] : memref<193xf32, #tpu.memory_space<smem>>
    %27 = vector.broadcast %26 : f32 to vector<1x128xf32>
    %28 = arith.mulf %7, %27 : vector<1x128xf32>
    %29 = arith.addf %25, %28 : vector<1x128xf32>
    %cst_9 = arith.constant 0.000000e+00 : f32
    %30 = vector.broadcast %cst_9 : f32 to vector<1x128xf32>
    %31 = arith.maximumf %29, %30 : vector<1x128xf32>
    %c160 = arith.constant 160 : index
    %32 = memref.load %arg2[%c160] : memref<193xf32, #tpu.memory_space<smem>>
    %33 = vector.broadcast %32 : f32 to vector<1x128xf32>
    %34 = arith.mulf %31, %33 : vector<1x128xf32>
    %35 = arith.addf %11, %34 : vector<1x128xf32>
    %c1_10 = arith.constant 1 : index
    %36 = memref.load %arg2[%c1_10] : memref<193xf32, #tpu.memory_space<smem>>
    %37 = vector.broadcast %36 : f32 to vector<1x128xf32>
    %38 = arith.mulf %1, %37 : vector<1x128xf32>
    %c129 = arith.constant 129 : index
    %39 = memref.load %arg2[%c129] : memref<193xf32, #tpu.memory_space<smem>>
    %40 = vector.broadcast %39 : f32 to vector<1x128xf32>
    %41 = arith.addf %38, %40 : vector<1x128xf32>
    %c33 = arith.constant 33 : index
    %42 = memref.load %arg2[%c33] : memref<193xf32, #tpu.memory_space<smem>>
    %43 = vector.broadcast %42 : f32 to vector<1x128xf32>
    %44 = arith.mulf %3, %43 : vector<1x128xf32>
    %45 = arith.addf %41, %44 : vector<1x128xf32>
    %c65 = arith.constant 65 : index
    %46 = memref.load %arg2[%c65] : memref<193xf32, #tpu.memory_space<smem>>
    %47 = vector.broadcast %46 : f32 to vector<1x128xf32>
    %48 = arith.mulf %5, %47 : vector<1x128xf32>
    %49 = arith.addf %45, %48 : vector<1x128xf32>
    %c97 = arith.constant 97 : index
    %50 = memref.load %arg2[%c97] : memref<193xf32, #tpu.memory_space<smem>>
    %51 = vector.broadcast %50 : f32 to vector<1x128xf32>
    %52 = arith.mulf %7, %51 : vector<1x128xf32>
    %53 = arith.addf %49, %52 : vector<1x128xf32>
    %cst_11 = arith.constant 0.000000e+00 : f32
    %54 = vector.broadcast %cst_11 : f32 to vector<1x128xf32>
    %55 = arith.maximumf %53, %54 : vector<1x128xf32>
    %c161 = arith.constant 161 : index
    %56 = memref.load %arg2[%c161] : memref<193xf32, #tpu.memory_space<smem>>
    %57 = vector.broadcast %56 : f32 to vector<1x128xf32>
    %58 = arith.mulf %55, %57 : vector<1x128xf32>
    %59 = arith.addf %35, %58 : vector<1x128xf32>
    %c2_12 = arith.constant 2 : index
    %60 = memref.load %arg2[%c2_12] : memref<193xf32, #tpu.memory_space<smem>>
    %61 = vector.broadcast %60 : f32 to vector<1x128xf32>
    %62 = arith.mulf %1, %61 : vector<1x128xf32>
    %c130 = arith.constant 130 : index
    %63 = memref.load %arg2[%c130] : memref<193xf32, #tpu.memory_space<smem>>
    %64 = vector.broadcast %63 : f32 to vector<1x128xf32>
    %65 = arith.addf %62, %64 : vector<1x128xf32>
    %c34 = arith.constant 34 : index
    %66 = memref.load %arg2[%c34] : memref<193xf32, #tpu.memory_space<smem>>
    %67 = vector.broadcast %66 : f32 to vector<1x128xf32>
    %68 = arith.mulf %3, %67 : vector<1x128xf32>
    %69 = arith.addf %65, %68 : vector<1x128xf32>
    %c66 = arith.constant 66 : index
    %70 = memref.load %arg2[%c66] : memref<193xf32, #tpu.memory_space<smem>>
    %71 = vector.broadcast %70 : f32 to vector<1x128xf32>
    %72 = arith.mulf %5, %71 : vector<1x128xf32>
    %73 = arith.addf %69, %72 : vector<1x128xf32>
    %c98 = arith.constant 98 : index
    %74 = memref.load %arg2[%c98] : memref<193xf32, #tpu.memory_space<smem>>
    %75 = vector.broadcast %74 : f32 to vector<1x128xf32>
    %76 = arith.mulf %7, %75 : vector<1x128xf32>
    %77 = arith.addf %73, %76 : vector<1x128xf32>
    %cst_13 = arith.constant 0.000000e+00 : f32
    %78 = vector.broadcast %cst_13 : f32 to vector<1x128xf32>
    %79 = arith.maximumf %77, %78 : vector<1x128xf32>
    %c162 = arith.constant 162 : index
    %80 = memref.load %arg2[%c162] : memref<193xf32, #tpu.memory_space<smem>>
    %81 = vector.broadcast %80 : f32 to vector<1x128xf32>
    %82 = arith.mulf %79, %81 : vector<1x128xf32>
    %83 = arith.addf %59, %82 : vector<1x128xf32>
    %c3_14 = arith.constant 3 : index
    %84 = memref.load %arg2[%c3_14] : memref<193xf32, #tpu.memory_space<smem>>
    %85 = vector.broadcast %84 : f32 to vector<1x128xf32>
    %86 = arith.mulf %1, %85 : vector<1x128xf32>
    %c131 = arith.constant 131 : index
    %87 = memref.load %arg2[%c131] : memref<193xf32, #tpu.memory_space<smem>>
    %88 = vector.broadcast %87 : f32 to vector<1x128xf32>
    %89 = arith.addf %86, %88 : vector<1x128xf32>
    %c35 = arith.constant 35 : index
    %90 = memref.load %arg2[%c35] : memref<193xf32, #tpu.memory_space<smem>>
    %91 = vector.broadcast %90 : f32 to vector<1x128xf32>
    %92 = arith.mulf %3, %91 : vector<1x128xf32>
    %93 = arith.addf %89, %92 : vector<1x128xf32>
    %c67 = arith.constant 67 : index
    %94 = memref.load %arg2[%c67] : memref<193xf32, #tpu.memory_space<smem>>
    %95 = vector.broadcast %94 : f32 to vector<1x128xf32>
    %96 = arith.mulf %5, %95 : vector<1x128xf32>
    %97 = arith.addf %93, %96 : vector<1x128xf32>
    %c99 = arith.constant 99 : index
    %98 = memref.load %arg2[%c99] : memref<193xf32, #tpu.memory_space<smem>>
    %99 = vector.broadcast %98 : f32 to vector<1x128xf32>
    %100 = arith.mulf %7, %99 : vector<1x128xf32>
    %101 = arith.addf %97, %100 : vector<1x128xf32>
    %cst_15 = arith.constant 0.000000e+00 : f32
    %102 = vector.broadcast %cst_15 : f32 to vector<1x128xf32>
    %103 = arith.maximumf %101, %102 : vector<1x128xf32>
    %c163 = arith.constant 163 : index
    %104 = memref.load %arg2[%c163] : memref<193xf32, #tpu.memory_space<smem>>
    %105 = vector.broadcast %104 : f32 to vector<1x128xf32>
    %106 = arith.mulf %103, %105 : vector<1x128xf32>
    %107 = arith.addf %83, %106 : vector<1x128xf32>
    %c4 = arith.constant 4 : index
    %108 = memref.load %arg2[%c4] : memref<193xf32, #tpu.memory_space<smem>>
    %109 = vector.broadcast %108 : f32 to vector<1x128xf32>
    %110 = arith.mulf %1, %109 : vector<1x128xf32>
    %c132 = arith.constant 132 : index
    %111 = memref.load %arg2[%c132] : memref<193xf32, #tpu.memory_space<smem>>
    %112 = vector.broadcast %111 : f32 to vector<1x128xf32>
    %113 = arith.addf %110, %112 : vector<1x128xf32>
    %c36 = arith.constant 36 : index
    %114 = memref.load %arg2[%c36] : memref<193xf32, #tpu.memory_space<smem>>
    %115 = vector.broadcast %114 : f32 to vector<1x128xf32>
    %116 = arith.mulf %3, %115 : vector<1x128xf32>
    %117 = arith.addf %113, %116 : vector<1x128xf32>
    %c68 = arith.constant 68 : index
    %118 = memref.load %arg2[%c68] : memref<193xf32, #tpu.memory_space<smem>>
    %119 = vector.broadcast %118 : f32 to vector<1x128xf32>
    %120 = arith.mulf %5, %119 : vector<1x128xf32>
    %121 = arith.addf %117, %120 : vector<1x128xf32>
    %c100 = arith.constant 100 : index
    %122 = memref.load %arg2[%c100] : memref<193xf32, #tpu.memory_space<smem>>
    %123 = vector.broadcast %122 : f32 to vector<1x128xf32>
    %124 = arith.mulf %7, %123 : vector<1x128xf32>
    %125 = arith.addf %121, %124 : vector<1x128xf32>
    %cst_16 = arith.constant 0.000000e+00 : f32
    %126 = vector.broadcast %cst_16 : f32 to vector<1x128xf32>
    %127 = arith.maximumf %125, %126 : vector<1x128xf32>
    %c164 = arith.constant 164 : index
    %128 = memref.load %arg2[%c164] : memref<193xf32, #tpu.memory_space<smem>>
    %129 = vector.broadcast %128 : f32 to vector<1x128xf32>
    %130 = arith.mulf %127, %129 : vector<1x128xf32>
    %131 = arith.addf %107, %130 : vector<1x128xf32>
    %c5 = arith.constant 5 : index
    %132 = memref.load %arg2[%c5] : memref<193xf32, #tpu.memory_space<smem>>
    %133 = vector.broadcast %132 : f32 to vector<1x128xf32>
    %134 = arith.mulf %1, %133 : vector<1x128xf32>
    %c133 = arith.constant 133 : index
    %135 = memref.load %arg2[%c133] : memref<193xf32, #tpu.memory_space<smem>>
    %136 = vector.broadcast %135 : f32 to vector<1x128xf32>
    %137 = arith.addf %134, %136 : vector<1x128xf32>
    %c37 = arith.constant 37 : index
    %138 = memref.load %arg2[%c37] : memref<193xf32, #tpu.memory_space<smem>>
    %139 = vector.broadcast %138 : f32 to vector<1x128xf32>
    %140 = arith.mulf %3, %139 : vector<1x128xf32>
    %141 = arith.addf %137, %140 : vector<1x128xf32>
    %c69 = arith.constant 69 : index
    %142 = memref.load %arg2[%c69] : memref<193xf32, #tpu.memory_space<smem>>
    %143 = vector.broadcast %142 : f32 to vector<1x128xf32>
    %144 = arith.mulf %5, %143 : vector<1x128xf32>
    %145 = arith.addf %141, %144 : vector<1x128xf32>
    %c101 = arith.constant 101 : index
    %146 = memref.load %arg2[%c101] : memref<193xf32, #tpu.memory_space<smem>>
    %147 = vector.broadcast %146 : f32 to vector<1x128xf32>
    %148 = arith.mulf %7, %147 : vector<1x128xf32>
    %149 = arith.addf %145, %148 : vector<1x128xf32>
    %cst_17 = arith.constant 0.000000e+00 : f32
    %150 = vector.broadcast %cst_17 : f32 to vector<1x128xf32>
    %151 = arith.maximumf %149, %150 : vector<1x128xf32>
    %c165 = arith.constant 165 : index
    %152 = memref.load %arg2[%c165] : memref<193xf32, #tpu.memory_space<smem>>
    %153 = vector.broadcast %152 : f32 to vector<1x128xf32>
    %154 = arith.mulf %151, %153 : vector<1x128xf32>
    %155 = arith.addf %131, %154 : vector<1x128xf32>
    %c6 = arith.constant 6 : index
    %156 = memref.load %arg2[%c6] : memref<193xf32, #tpu.memory_space<smem>>
    %157 = vector.broadcast %156 : f32 to vector<1x128xf32>
    %158 = arith.mulf %1, %157 : vector<1x128xf32>
    %c134 = arith.constant 134 : index
    %159 = memref.load %arg2[%c134] : memref<193xf32, #tpu.memory_space<smem>>
    %160 = vector.broadcast %159 : f32 to vector<1x128xf32>
    %161 = arith.addf %158, %160 : vector<1x128xf32>
    %c38 = arith.constant 38 : index
    %162 = memref.load %arg2[%c38] : memref<193xf32, #tpu.memory_space<smem>>
    %163 = vector.broadcast %162 : f32 to vector<1x128xf32>
    %164 = arith.mulf %3, %163 : vector<1x128xf32>
    %165 = arith.addf %161, %164 : vector<1x128xf32>
    %c70 = arith.constant 70 : index
    %166 = memref.load %arg2[%c70] : memref<193xf32, #tpu.memory_space<smem>>
    %167 = vector.broadcast %166 : f32 to vector<1x128xf32>
    %168 = arith.mulf %5, %167 : vector<1x128xf32>
    %169 = arith.addf %165, %168 : vector<1x128xf32>
    %c102 = arith.constant 102 : index
    %170 = memref.load %arg2[%c102] : memref<193xf32, #tpu.memory_space<smem>>
    %171 = vector.broadcast %170 : f32 to vector<1x128xf32>
    %172 = arith.mulf %7, %171 : vector<1x128xf32>
    %173 = arith.addf %169, %172 : vector<1x128xf32>
    %cst_18 = arith.constant 0.000000e+00 : f32
    %174 = vector.broadcast %cst_18 : f32 to vector<1x128xf32>
    %175 = arith.maximumf %173, %174 : vector<1x128xf32>
    %c166 = arith.constant 166 : index
    %176 = memref.load %arg2[%c166] : memref<193xf32, #tpu.memory_space<smem>>
    %177 = vector.broadcast %176 : f32 to vector<1x128xf32>
    %178 = arith.mulf %175, %177 : vector<1x128xf32>
    %179 = arith.addf %155, %178 : vector<1x128xf32>
    %c7 = arith.constant 7 : index
    %180 = memref.load %arg2[%c7] : memref<193xf32, #tpu.memory_space<smem>>
    %181 = vector.broadcast %180 : f32 to vector<1x128xf32>
    %182 = arith.mulf %1, %181 : vector<1x128xf32>
    %c135 = arith.constant 135 : index
    %183 = memref.load %arg2[%c135] : memref<193xf32, #tpu.memory_space<smem>>
    %184 = vector.broadcast %183 : f32 to vector<1x128xf32>
    %185 = arith.addf %182, %184 : vector<1x128xf32>
    %c39 = arith.constant 39 : index
    %186 = memref.load %arg2[%c39] : memref<193xf32, #tpu.memory_space<smem>>
    %187 = vector.broadcast %186 : f32 to vector<1x128xf32>
    %188 = arith.mulf %3, %187 : vector<1x128xf32>
    %189 = arith.addf %185, %188 : vector<1x128xf32>
    %c71 = arith.constant 71 : index
    %190 = memref.load %arg2[%c71] : memref<193xf32, #tpu.memory_space<smem>>
    %191 = vector.broadcast %190 : f32 to vector<1x128xf32>
    %192 = arith.mulf %5, %191 : vector<1x128xf32>
    %193 = arith.addf %189, %192 : vector<1x128xf32>
    %c103 = arith.constant 103 : index
    %194 = memref.load %arg2[%c103] : memref<193xf32, #tpu.memory_space<smem>>
    %195 = vector.broadcast %194 : f32 to vector<1x128xf32>
    %196 = arith.mulf %7, %195 : vector<1x128xf32>
    %197 = arith.addf %193, %196 : vector<1x128xf32>
    %cst_19 = arith.constant 0.000000e+00 : f32
    %198 = vector.broadcast %cst_19 : f32 to vector<1x128xf32>
    %199 = arith.maximumf %197, %198 : vector<1x128xf32>
    %c167 = arith.constant 167 : index
    %200 = memref.load %arg2[%c167] : memref<193xf32, #tpu.memory_space<smem>>
    %201 = vector.broadcast %200 : f32 to vector<1x128xf32>
    %202 = arith.mulf %199, %201 : vector<1x128xf32>
    %203 = arith.addf %179, %202 : vector<1x128xf32>
    %c8 = arith.constant 8 : index
    %204 = memref.load %arg2[%c8] : memref<193xf32, #tpu.memory_space<smem>>
    %205 = vector.broadcast %204 : f32 to vector<1x128xf32>
    %206 = arith.mulf %1, %205 : vector<1x128xf32>
    %c136 = arith.constant 136 : index
    %207 = memref.load %arg2[%c136] : memref<193xf32, #tpu.memory_space<smem>>
    %208 = vector.broadcast %207 : f32 to vector<1x128xf32>
    %209 = arith.addf %206, %208 : vector<1x128xf32>
    %c40 = arith.constant 40 : index
    %210 = memref.load %arg2[%c40] : memref<193xf32, #tpu.memory_space<smem>>
    %211 = vector.broadcast %210 : f32 to vector<1x128xf32>
    %212 = arith.mulf %3, %211 : vector<1x128xf32>
    %213 = arith.addf %209, %212 : vector<1x128xf32>
    %c72 = arith.constant 72 : index
    %214 = memref.load %arg2[%c72] : memref<193xf32, #tpu.memory_space<smem>>
    %215 = vector.broadcast %214 : f32 to vector<1x128xf32>
    %216 = arith.mulf %5, %215 : vector<1x128xf32>
    %217 = arith.addf %213, %216 : vector<1x128xf32>
    %c104 = arith.constant 104 : index
    %218 = memref.load %arg2[%c104] : memref<193xf32, #tpu.memory_space<smem>>
    %219 = vector.broadcast %218 : f32 to vector<1x128xf32>
    %220 = arith.mulf %7, %219 : vector<1x128xf32>
    %221 = arith.addf %217, %220 : vector<1x128xf32>
    %cst_20 = arith.constant 0.000000e+00 : f32
    %222 = vector.broadcast %cst_20 : f32 to vector<1x128xf32>
    %223 = arith.maximumf %221, %222 : vector<1x128xf32>
    %c168 = arith.constant 168 : index
    %224 = memref.load %arg2[%c168] : memref<193xf32, #tpu.memory_space<smem>>
    %225 = vector.broadcast %224 : f32 to vector<1x128xf32>
    %226 = arith.mulf %223, %225 : vector<1x128xf32>
    %227 = arith.addf %203, %226 : vector<1x128xf32>
    %c9 = arith.constant 9 : index
    %228 = memref.load %arg2[%c9] : memref<193xf32, #tpu.memory_space<smem>>
    %229 = vector.broadcast %228 : f32 to vector<1x128xf32>
    %230 = arith.mulf %1, %229 : vector<1x128xf32>
    %c137 = arith.constant 137 : index
    %231 = memref.load %arg2[%c137] : memref<193xf32, #tpu.memory_space<smem>>
    %232 = vector.broadcast %231 : f32 to vector<1x128xf32>
    %233 = arith.addf %230, %232 : vector<1x128xf32>
    %c41 = arith.constant 41 : index
    %234 = memref.load %arg2[%c41] : memref<193xf32, #tpu.memory_space<smem>>
    %235 = vector.broadcast %234 : f32 to vector<1x128xf32>
    %236 = arith.mulf %3, %235 : vector<1x128xf32>
    %237 = arith.addf %233, %236 : vector<1x128xf32>
    %c73 = arith.constant 73 : index
    %238 = memref.load %arg2[%c73] : memref<193xf32, #tpu.memory_space<smem>>
    %239 = vector.broadcast %238 : f32 to vector<1x128xf32>
    %240 = arith.mulf %5, %239 : vector<1x128xf32>
    %241 = arith.addf %237, %240 : vector<1x128xf32>
    %c105 = arith.constant 105 : index
    %242 = memref.load %arg2[%c105] : memref<193xf32, #tpu.memory_space<smem>>
    %243 = vector.broadcast %242 : f32 to vector<1x128xf32>
    %244 = arith.mulf %7, %243 : vector<1x128xf32>
    %245 = arith.addf %241, %244 : vector<1x128xf32>
    %cst_21 = arith.constant 0.000000e+00 : f32
    %246 = vector.broadcast %cst_21 : f32 to vector<1x128xf32>
    %247 = arith.maximumf %245, %246 : vector<1x128xf32>
    %c169 = arith.constant 169 : index
    %248 = memref.load %arg2[%c169] : memref<193xf32, #tpu.memory_space<smem>>
    %249 = vector.broadcast %248 : f32 to vector<1x128xf32>
    %250 = arith.mulf %247, %249 : vector<1x128xf32>
    %251 = arith.addf %227, %250 : vector<1x128xf32>
    %c10 = arith.constant 10 : index
    %252 = memref.load %arg2[%c10] : memref<193xf32, #tpu.memory_space<smem>>
    %253 = vector.broadcast %252 : f32 to vector<1x128xf32>
    %254 = arith.mulf %1, %253 : vector<1x128xf32>
    %c138 = arith.constant 138 : index
    %255 = memref.load %arg2[%c138] : memref<193xf32, #tpu.memory_space<smem>>
    %256 = vector.broadcast %255 : f32 to vector<1x128xf32>
    %257 = arith.addf %254, %256 : vector<1x128xf32>
    %c42 = arith.constant 42 : index
    %258 = memref.load %arg2[%c42] : memref<193xf32, #tpu.memory_space<smem>>
    %259 = vector.broadcast %258 : f32 to vector<1x128xf32>
    %260 = arith.mulf %3, %259 : vector<1x128xf32>
    %261 = arith.addf %257, %260 : vector<1x128xf32>
    %c74 = arith.constant 74 : index
    %262 = memref.load %arg2[%c74] : memref<193xf32, #tpu.memory_space<smem>>
    %263 = vector.broadcast %262 : f32 to vector<1x128xf32>
    %264 = arith.mulf %5, %263 : vector<1x128xf32>
    %265 = arith.addf %261, %264 : vector<1x128xf32>
    %c106 = arith.constant 106 : index
    %266 = memref.load %arg2[%c106] : memref<193xf32, #tpu.memory_space<smem>>
    %267 = vector.broadcast %266 : f32 to vector<1x128xf32>
    %268 = arith.mulf %7, %267 : vector<1x128xf32>
    %269 = arith.addf %265, %268 : vector<1x128xf32>
    %cst_22 = arith.constant 0.000000e+00 : f32
    %270 = vector.broadcast %cst_22 : f32 to vector<1x128xf32>
    %271 = arith.maximumf %269, %270 : vector<1x128xf32>
    %c170 = arith.constant 170 : index
    %272 = memref.load %arg2[%c170] : memref<193xf32, #tpu.memory_space<smem>>
    %273 = vector.broadcast %272 : f32 to vector<1x128xf32>
    %274 = arith.mulf %271, %273 : vector<1x128xf32>
    %275 = arith.addf %251, %274 : vector<1x128xf32>
    %c11 = arith.constant 11 : index
    %276 = memref.load %arg2[%c11] : memref<193xf32, #tpu.memory_space<smem>>
    %277 = vector.broadcast %276 : f32 to vector<1x128xf32>
    %278 = arith.mulf %1, %277 : vector<1x128xf32>
    %c139 = arith.constant 139 : index
    %279 = memref.load %arg2[%c139] : memref<193xf32, #tpu.memory_space<smem>>
    %280 = vector.broadcast %279 : f32 to vector<1x128xf32>
    %281 = arith.addf %278, %280 : vector<1x128xf32>
    %c43 = arith.constant 43 : index
    %282 = memref.load %arg2[%c43] : memref<193xf32, #tpu.memory_space<smem>>
    %283 = vector.broadcast %282 : f32 to vector<1x128xf32>
    %284 = arith.mulf %3, %283 : vector<1x128xf32>
    %285 = arith.addf %281, %284 : vector<1x128xf32>
    %c75 = arith.constant 75 : index
    %286 = memref.load %arg2[%c75] : memref<193xf32, #tpu.memory_space<smem>>
    %287 = vector.broadcast %286 : f32 to vector<1x128xf32>
    %288 = arith.mulf %5, %287 : vector<1x128xf32>
    %289 = arith.addf %285, %288 : vector<1x128xf32>
    %c107 = arith.constant 107 : index
    %290 = memref.load %arg2[%c107] : memref<193xf32, #tpu.memory_space<smem>>
    %291 = vector.broadcast %290 : f32 to vector<1x128xf32>
    %292 = arith.mulf %7, %291 : vector<1x128xf32>
    %293 = arith.addf %289, %292 : vector<1x128xf32>
    %cst_23 = arith.constant 0.000000e+00 : f32
    %294 = vector.broadcast %cst_23 : f32 to vector<1x128xf32>
    %295 = arith.maximumf %293, %294 : vector<1x128xf32>
    %c171 = arith.constant 171 : index
    %296 = memref.load %arg2[%c171] : memref<193xf32, #tpu.memory_space<smem>>
    %297 = vector.broadcast %296 : f32 to vector<1x128xf32>
    %298 = arith.mulf %295, %297 : vector<1x128xf32>
    %299 = arith.addf %275, %298 : vector<1x128xf32>
    %c12 = arith.constant 12 : index
    %300 = memref.load %arg2[%c12] : memref<193xf32, #tpu.memory_space<smem>>
    %301 = vector.broadcast %300 : f32 to vector<1x128xf32>
    %302 = arith.mulf %1, %301 : vector<1x128xf32>
    %c140 = arith.constant 140 : index
    %303 = memref.load %arg2[%c140] : memref<193xf32, #tpu.memory_space<smem>>
    %304 = vector.broadcast %303 : f32 to vector<1x128xf32>
    %305 = arith.addf %302, %304 : vector<1x128xf32>
    %c44 = arith.constant 44 : index
    %306 = memref.load %arg2[%c44] : memref<193xf32, #tpu.memory_space<smem>>
    %307 = vector.broadcast %306 : f32 to vector<1x128xf32>
    %308 = arith.mulf %3, %307 : vector<1x128xf32>
    %309 = arith.addf %305, %308 : vector<1x128xf32>
    %c76 = arith.constant 76 : index
    %310 = memref.load %arg2[%c76] : memref<193xf32, #tpu.memory_space<smem>>
    %311 = vector.broadcast %310 : f32 to vector<1x128xf32>
    %312 = arith.mulf %5, %311 : vector<1x128xf32>
    %313 = arith.addf %309, %312 : vector<1x128xf32>
    %c108 = arith.constant 108 : index
    %314 = memref.load %arg2[%c108] : memref<193xf32, #tpu.memory_space<smem>>
    %315 = vector.broadcast %314 : f32 to vector<1x128xf32>
    %316 = arith.mulf %7, %315 : vector<1x128xf32>
    %317 = arith.addf %313, %316 : vector<1x128xf32>
    %cst_24 = arith.constant 0.000000e+00 : f32
    %318 = vector.broadcast %cst_24 : f32 to vector<1x128xf32>
    %319 = arith.maximumf %317, %318 : vector<1x128xf32>
    %c172 = arith.constant 172 : index
    %320 = memref.load %arg2[%c172] : memref<193xf32, #tpu.memory_space<smem>>
    %321 = vector.broadcast %320 : f32 to vector<1x128xf32>
    %322 = arith.mulf %319, %321 : vector<1x128xf32>
    %323 = arith.addf %299, %322 : vector<1x128xf32>
    %c13 = arith.constant 13 : index
    %324 = memref.load %arg2[%c13] : memref<193xf32, #tpu.memory_space<smem>>
    %325 = vector.broadcast %324 : f32 to vector<1x128xf32>
    %326 = arith.mulf %1, %325 : vector<1x128xf32>
    %c141 = arith.constant 141 : index
    %327 = memref.load %arg2[%c141] : memref<193xf32, #tpu.memory_space<smem>>
    %328 = vector.broadcast %327 : f32 to vector<1x128xf32>
    %329 = arith.addf %326, %328 : vector<1x128xf32>
    %c45 = arith.constant 45 : index
    %330 = memref.load %arg2[%c45] : memref<193xf32, #tpu.memory_space<smem>>
    %331 = vector.broadcast %330 : f32 to vector<1x128xf32>
    %332 = arith.mulf %3, %331 : vector<1x128xf32>
    %333 = arith.addf %329, %332 : vector<1x128xf32>
    %c77 = arith.constant 77 : index
    %334 = memref.load %arg2[%c77] : memref<193xf32, #tpu.memory_space<smem>>
    %335 = vector.broadcast %334 : f32 to vector<1x128xf32>
    %336 = arith.mulf %5, %335 : vector<1x128xf32>
    %337 = arith.addf %333, %336 : vector<1x128xf32>
    %c109 = arith.constant 109 : index
    %338 = memref.load %arg2[%c109] : memref<193xf32, #tpu.memory_space<smem>>
    %339 = vector.broadcast %338 : f32 to vector<1x128xf32>
    %340 = arith.mulf %7, %339 : vector<1x128xf32>
    %341 = arith.addf %337, %340 : vector<1x128xf32>
    %cst_25 = arith.constant 0.000000e+00 : f32
    %342 = vector.broadcast %cst_25 : f32 to vector<1x128xf32>
    %343 = arith.maximumf %341, %342 : vector<1x128xf32>
    %c173 = arith.constant 173 : index
    %344 = memref.load %arg2[%c173] : memref<193xf32, #tpu.memory_space<smem>>
    %345 = vector.broadcast %344 : f32 to vector<1x128xf32>
    %346 = arith.mulf %343, %345 : vector<1x128xf32>
    %347 = arith.addf %323, %346 : vector<1x128xf32>
    %c14 = arith.constant 14 : index
    %348 = memref.load %arg2[%c14] : memref<193xf32, #tpu.memory_space<smem>>
    %349 = vector.broadcast %348 : f32 to vector<1x128xf32>
    %350 = arith.mulf %1, %349 : vector<1x128xf32>
    %c142 = arith.constant 142 : index
    %351 = memref.load %arg2[%c142] : memref<193xf32, #tpu.memory_space<smem>>
    %352 = vector.broadcast %351 : f32 to vector<1x128xf32>
    %353 = arith.addf %350, %352 : vector<1x128xf32>
    %c46 = arith.constant 46 : index
    %354 = memref.load %arg2[%c46] : memref<193xf32, #tpu.memory_space<smem>>
    %355 = vector.broadcast %354 : f32 to vector<1x128xf32>
    %356 = arith.mulf %3, %355 : vector<1x128xf32>
    %357 = arith.addf %353, %356 : vector<1x128xf32>
    %c78 = arith.constant 78 : index
    %358 = memref.load %arg2[%c78] : memref<193xf32, #tpu.memory_space<smem>>
    %359 = vector.broadcast %358 : f32 to vector<1x128xf32>
    %360 = arith.mulf %5, %359 : vector<1x128xf32>
    %361 = arith.addf %357, %360 : vector<1x128xf32>
    %c110 = arith.constant 110 : index
    %362 = memref.load %arg2[%c110] : memref<193xf32, #tpu.memory_space<smem>>
    %363 = vector.broadcast %362 : f32 to vector<1x128xf32>
    %364 = arith.mulf %7, %363 : vector<1x128xf32>
    %365 = arith.addf %361, %364 : vector<1x128xf32>
    %cst_26 = arith.constant 0.000000e+00 : f32
    %366 = vector.broadcast %cst_26 : f32 to vector<1x128xf32>
    %367 = arith.maximumf %365, %366 : vector<1x128xf32>
    %c174 = arith.constant 174 : index
    %368 = memref.load %arg2[%c174] : memref<193xf32, #tpu.memory_space<smem>>
    %369 = vector.broadcast %368 : f32 to vector<1x128xf32>
    %370 = arith.mulf %367, %369 : vector<1x128xf32>
    %371 = arith.addf %347, %370 : vector<1x128xf32>
    %c15 = arith.constant 15 : index
    %372 = memref.load %arg2[%c15] : memref<193xf32, #tpu.memory_space<smem>>
    %373 = vector.broadcast %372 : f32 to vector<1x128xf32>
    %374 = arith.mulf %1, %373 : vector<1x128xf32>
    %c143 = arith.constant 143 : index
    %375 = memref.load %arg2[%c143] : memref<193xf32, #tpu.memory_space<smem>>
    %376 = vector.broadcast %375 : f32 to vector<1x128xf32>
    %377 = arith.addf %374, %376 : vector<1x128xf32>
    %c47 = arith.constant 47 : index
    %378 = memref.load %arg2[%c47] : memref<193xf32, #tpu.memory_space<smem>>
    %379 = vector.broadcast %378 : f32 to vector<1x128xf32>
    %380 = arith.mulf %3, %379 : vector<1x128xf32>
    %381 = arith.addf %377, %380 : vector<1x128xf32>
    %c79 = arith.constant 79 : index
    %382 = memref.load %arg2[%c79] : memref<193xf32, #tpu.memory_space<smem>>
    %383 = vector.broadcast %382 : f32 to vector<1x128xf32>
    %384 = arith.mulf %5, %383 : vector<1x128xf32>
    %385 = arith.addf %381, %384 : vector<1x128xf32>
    %c111 = arith.constant 111 : index
    %386 = memref.load %arg2[%c111] : memref<193xf32, #tpu.memory_space<smem>>
    %387 = vector.broadcast %386 : f32 to vector<1x128xf32>
    %388 = arith.mulf %7, %387 : vector<1x128xf32>
    %389 = arith.addf %385, %388 : vector<1x128xf32>
    %cst_27 = arith.constant 0.000000e+00 : f32
    %390 = vector.broadcast %cst_27 : f32 to vector<1x128xf32>
    %391 = arith.maximumf %389, %390 : vector<1x128xf32>
    %c175 = arith.constant 175 : index
    %392 = memref.load %arg2[%c175] : memref<193xf32, #tpu.memory_space<smem>>
    %393 = vector.broadcast %392 : f32 to vector<1x128xf32>
    %394 = arith.mulf %391, %393 : vector<1x128xf32>
    %395 = arith.addf %371, %394 : vector<1x128xf32>
    %c16 = arith.constant 16 : index
    %396 = memref.load %arg2[%c16] : memref<193xf32, #tpu.memory_space<smem>>
    %397 = vector.broadcast %396 : f32 to vector<1x128xf32>
    %398 = arith.mulf %1, %397 : vector<1x128xf32>
    %c144 = arith.constant 144 : index
    %399 = memref.load %arg2[%c144] : memref<193xf32, #tpu.memory_space<smem>>
    %400 = vector.broadcast %399 : f32 to vector<1x128xf32>
    %401 = arith.addf %398, %400 : vector<1x128xf32>
    %c48 = arith.constant 48 : index
    %402 = memref.load %arg2[%c48] : memref<193xf32, #tpu.memory_space<smem>>
    %403 = vector.broadcast %402 : f32 to vector<1x128xf32>
    %404 = arith.mulf %3, %403 : vector<1x128xf32>
    %405 = arith.addf %401, %404 : vector<1x128xf32>
    %c80 = arith.constant 80 : index
    %406 = memref.load %arg2[%c80] : memref<193xf32, #tpu.memory_space<smem>>
    %407 = vector.broadcast %406 : f32 to vector<1x128xf32>
    %408 = arith.mulf %5, %407 : vector<1x128xf32>
    %409 = arith.addf %405, %408 : vector<1x128xf32>
    %c112 = arith.constant 112 : index
    %410 = memref.load %arg2[%c112] : memref<193xf32, #tpu.memory_space<smem>>
    %411 = vector.broadcast %410 : f32 to vector<1x128xf32>
    %412 = arith.mulf %7, %411 : vector<1x128xf32>
    %413 = arith.addf %409, %412 : vector<1x128xf32>
    %cst_28 = arith.constant 0.000000e+00 : f32
    %414 = vector.broadcast %cst_28 : f32 to vector<1x128xf32>
    %415 = arith.maximumf %413, %414 : vector<1x128xf32>
    %c176 = arith.constant 176 : index
    %416 = memref.load %arg2[%c176] : memref<193xf32, #tpu.memory_space<smem>>
    %417 = vector.broadcast %416 : f32 to vector<1x128xf32>
    %418 = arith.mulf %415, %417 : vector<1x128xf32>
    %419 = arith.addf %395, %418 : vector<1x128xf32>
    %c17 = arith.constant 17 : index
    %420 = memref.load %arg2[%c17] : memref<193xf32, #tpu.memory_space<smem>>
    %421 = vector.broadcast %420 : f32 to vector<1x128xf32>
    %422 = arith.mulf %1, %421 : vector<1x128xf32>
    %c145 = arith.constant 145 : index
    %423 = memref.load %arg2[%c145] : memref<193xf32, #tpu.memory_space<smem>>
    %424 = vector.broadcast %423 : f32 to vector<1x128xf32>
    %425 = arith.addf %422, %424 : vector<1x128xf32>
    %c49 = arith.constant 49 : index
    %426 = memref.load %arg2[%c49] : memref<193xf32, #tpu.memory_space<smem>>
    %427 = vector.broadcast %426 : f32 to vector<1x128xf32>
    %428 = arith.mulf %3, %427 : vector<1x128xf32>
    %429 = arith.addf %425, %428 : vector<1x128xf32>
    %c81 = arith.constant 81 : index
    %430 = memref.load %arg2[%c81] : memref<193xf32, #tpu.memory_space<smem>>
    %431 = vector.broadcast %430 : f32 to vector<1x128xf32>
    %432 = arith.mulf %5, %431 : vector<1x128xf32>
    %433 = arith.addf %429, %432 : vector<1x128xf32>
    %c113 = arith.constant 113 : index
    %434 = memref.load %arg2[%c113] : memref<193xf32, #tpu.memory_space<smem>>
    %435 = vector.broadcast %434 : f32 to vector<1x128xf32>
    %436 = arith.mulf %7, %435 : vector<1x128xf32>
    %437 = arith.addf %433, %436 : vector<1x128xf32>
    %cst_29 = arith.constant 0.000000e+00 : f32
    %438 = vector.broadcast %cst_29 : f32 to vector<1x128xf32>
    %439 = arith.maximumf %437, %438 : vector<1x128xf32>
    %c177 = arith.constant 177 : index
    %440 = memref.load %arg2[%c177] : memref<193xf32, #tpu.memory_space<smem>>
    %441 = vector.broadcast %440 : f32 to vector<1x128xf32>
    %442 = arith.mulf %439, %441 : vector<1x128xf32>
    %443 = arith.addf %419, %442 : vector<1x128xf32>
    %c18 = arith.constant 18 : index
    %444 = memref.load %arg2[%c18] : memref<193xf32, #tpu.memory_space<smem>>
    %445 = vector.broadcast %444 : f32 to vector<1x128xf32>
    %446 = arith.mulf %1, %445 : vector<1x128xf32>
    %c146 = arith.constant 146 : index
    %447 = memref.load %arg2[%c146] : memref<193xf32, #tpu.memory_space<smem>>
    %448 = vector.broadcast %447 : f32 to vector<1x128xf32>
    %449 = arith.addf %446, %448 : vector<1x128xf32>
    %c50 = arith.constant 50 : index
    %450 = memref.load %arg2[%c50] : memref<193xf32, #tpu.memory_space<smem>>
    %451 = vector.broadcast %450 : f32 to vector<1x128xf32>
    %452 = arith.mulf %3, %451 : vector<1x128xf32>
    %453 = arith.addf %449, %452 : vector<1x128xf32>
    %c82 = arith.constant 82 : index
    %454 = memref.load %arg2[%c82] : memref<193xf32, #tpu.memory_space<smem>>
    %455 = vector.broadcast %454 : f32 to vector<1x128xf32>
    %456 = arith.mulf %5, %455 : vector<1x128xf32>
    %457 = arith.addf %453, %456 : vector<1x128xf32>
    %c114 = arith.constant 114 : index
    %458 = memref.load %arg2[%c114] : memref<193xf32, #tpu.memory_space<smem>>
    %459 = vector.broadcast %458 : f32 to vector<1x128xf32>
    %460 = arith.mulf %7, %459 : vector<1x128xf32>
    %461 = arith.addf %457, %460 : vector<1x128xf32>
    %cst_30 = arith.constant 0.000000e+00 : f32
    %462 = vector.broadcast %cst_30 : f32 to vector<1x128xf32>
    %463 = arith.maximumf %461, %462 : vector<1x128xf32>
    %c178 = arith.constant 178 : index
    %464 = memref.load %arg2[%c178] : memref<193xf32, #tpu.memory_space<smem>>
    %465 = vector.broadcast %464 : f32 to vector<1x128xf32>
    %466 = arith.mulf %463, %465 : vector<1x128xf32>
    %467 = arith.addf %443, %466 : vector<1x128xf32>
    %c19 = arith.constant 19 : index
    %468 = memref.load %arg2[%c19] : memref<193xf32, #tpu.memory_space<smem>>
    %469 = vector.broadcast %468 : f32 to vector<1x128xf32>
    %470 = arith.mulf %1, %469 : vector<1x128xf32>
    %c147 = arith.constant 147 : index
    %471 = memref.load %arg2[%c147] : memref<193xf32, #tpu.memory_space<smem>>
    %472 = vector.broadcast %471 : f32 to vector<1x128xf32>
    %473 = arith.addf %470, %472 : vector<1x128xf32>
    %c51 = arith.constant 51 : index
    %474 = memref.load %arg2[%c51] : memref<193xf32, #tpu.memory_space<smem>>
    %475 = vector.broadcast %474 : f32 to vector<1x128xf32>
    %476 = arith.mulf %3, %475 : vector<1x128xf32>
    %477 = arith.addf %473, %476 : vector<1x128xf32>
    %c83 = arith.constant 83 : index
    %478 = memref.load %arg2[%c83] : memref<193xf32, #tpu.memory_space<smem>>
    %479 = vector.broadcast %478 : f32 to vector<1x128xf32>
    %480 = arith.mulf %5, %479 : vector<1x128xf32>
    %481 = arith.addf %477, %480 : vector<1x128xf32>
    %c115 = arith.constant 115 : index
    %482 = memref.load %arg2[%c115] : memref<193xf32, #tpu.memory_space<smem>>
    %483 = vector.broadcast %482 : f32 to vector<1x128xf32>
    %484 = arith.mulf %7, %483 : vector<1x128xf32>
    %485 = arith.addf %481, %484 : vector<1x128xf32>
    %cst_31 = arith.constant 0.000000e+00 : f32
    %486 = vector.broadcast %cst_31 : f32 to vector<1x128xf32>
    %487 = arith.maximumf %485, %486 : vector<1x128xf32>
    %c179 = arith.constant 179 : index
    %488 = memref.load %arg2[%c179] : memref<193xf32, #tpu.memory_space<smem>>
    %489 = vector.broadcast %488 : f32 to vector<1x128xf32>
    %490 = arith.mulf %487, %489 : vector<1x128xf32>
    %491 = arith.addf %467, %490 : vector<1x128xf32>
    %c20 = arith.constant 20 : index
    %492 = memref.load %arg2[%c20] : memref<193xf32, #tpu.memory_space<smem>>
    %493 = vector.broadcast %492 : f32 to vector<1x128xf32>
    %494 = arith.mulf %1, %493 : vector<1x128xf32>
    %c148 = arith.constant 148 : index
    %495 = memref.load %arg2[%c148] : memref<193xf32, #tpu.memory_space<smem>>
    %496 = vector.broadcast %495 : f32 to vector<1x128xf32>
    %497 = arith.addf %494, %496 : vector<1x128xf32>
    %c52 = arith.constant 52 : index
    %498 = memref.load %arg2[%c52] : memref<193xf32, #tpu.memory_space<smem>>
    %499 = vector.broadcast %498 : f32 to vector<1x128xf32>
    %500 = arith.mulf %3, %499 : vector<1x128xf32>
    %501 = arith.addf %497, %500 : vector<1x128xf32>
    %c84 = arith.constant 84 : index
    %502 = memref.load %arg2[%c84] : memref<193xf32, #tpu.memory_space<smem>>
    %503 = vector.broadcast %502 : f32 to vector<1x128xf32>
    %504 = arith.mulf %5, %503 : vector<1x128xf32>
    %505 = arith.addf %501, %504 : vector<1x128xf32>
    %c116 = arith.constant 116 : index
    %506 = memref.load %arg2[%c116] : memref<193xf32, #tpu.memory_space<smem>>
    %507 = vector.broadcast %506 : f32 to vector<1x128xf32>
    %508 = arith.mulf %7, %507 : vector<1x128xf32>
    %509 = arith.addf %505, %508 : vector<1x128xf32>
    %cst_32 = arith.constant 0.000000e+00 : f32
    %510 = vector.broadcast %cst_32 : f32 to vector<1x128xf32>
    %511 = arith.maximumf %509, %510 : vector<1x128xf32>
    %c180 = arith.constant 180 : index
    %512 = memref.load %arg2[%c180] : memref<193xf32, #tpu.memory_space<smem>>
    %513 = vector.broadcast %512 : f32 to vector<1x128xf32>
    %514 = arith.mulf %511, %513 : vector<1x128xf32>
    %515 = arith.addf %491, %514 : vector<1x128xf32>
    %c21 = arith.constant 21 : index
    %516 = memref.load %arg2[%c21] : memref<193xf32, #tpu.memory_space<smem>>
    %517 = vector.broadcast %516 : f32 to vector<1x128xf32>
    %518 = arith.mulf %1, %517 : vector<1x128xf32>
    %c149 = arith.constant 149 : index
    %519 = memref.load %arg2[%c149] : memref<193xf32, #tpu.memory_space<smem>>
    %520 = vector.broadcast %519 : f32 to vector<1x128xf32>
    %521 = arith.addf %518, %520 : vector<1x128xf32>
    %c53 = arith.constant 53 : index
    %522 = memref.load %arg2[%c53] : memref<193xf32, #tpu.memory_space<smem>>
    %523 = vector.broadcast %522 : f32 to vector<1x128xf32>
    %524 = arith.mulf %3, %523 : vector<1x128xf32>
    %525 = arith.addf %521, %524 : vector<1x128xf32>
    %c85 = arith.constant 85 : index
    %526 = memref.load %arg2[%c85] : memref<193xf32, #tpu.memory_space<smem>>
    %527 = vector.broadcast %526 : f32 to vector<1x128xf32>
    %528 = arith.mulf %5, %527 : vector<1x128xf32>
    %529 = arith.addf %525, %528 : vector<1x128xf32>
    %c117 = arith.constant 117 : index
    %530 = memref.load %arg2[%c117] : memref<193xf32, #tpu.memory_space<smem>>
    %531 = vector.broadcast %530 : f32 to vector<1x128xf32>
    %532 = arith.mulf %7, %531 : vector<1x128xf32>
    %533 = arith.addf %529, %532 : vector<1x128xf32>
    %cst_33 = arith.constant 0.000000e+00 : f32
    %534 = vector.broadcast %cst_33 : f32 to vector<1x128xf32>
    %535 = arith.maximumf %533, %534 : vector<1x128xf32>
    %c181 = arith.constant 181 : index
    %536 = memref.load %arg2[%c181] : memref<193xf32, #tpu.memory_space<smem>>
    %537 = vector.broadcast %536 : f32 to vector<1x128xf32>
    %538 = arith.mulf %535, %537 : vector<1x128xf32>
    %539 = arith.addf %515, %538 : vector<1x128xf32>
    %c22 = arith.constant 22 : index
    %540 = memref.load %arg2[%c22] : memref<193xf32, #tpu.memory_space<smem>>
    %541 = vector.broadcast %540 : f32 to vector<1x128xf32>
    %542 = arith.mulf %1, %541 : vector<1x128xf32>
    %c150 = arith.constant 150 : index
    %543 = memref.load %arg2[%c150] : memref<193xf32, #tpu.memory_space<smem>>
    %544 = vector.broadcast %543 : f32 to vector<1x128xf32>
    %545 = arith.addf %542, %544 : vector<1x128xf32>
    %c54 = arith.constant 54 : index
    %546 = memref.load %arg2[%c54] : memref<193xf32, #tpu.memory_space<smem>>
    %547 = vector.broadcast %546 : f32 to vector<1x128xf32>
    %548 = arith.mulf %3, %547 : vector<1x128xf32>
    %549 = arith.addf %545, %548 : vector<1x128xf32>
    %c86 = arith.constant 86 : index
    %550 = memref.load %arg2[%c86] : memref<193xf32, #tpu.memory_space<smem>>
    %551 = vector.broadcast %550 : f32 to vector<1x128xf32>
    %552 = arith.mulf %5, %551 : vector<1x128xf32>
    %553 = arith.addf %549, %552 : vector<1x128xf32>
    %c118 = arith.constant 118 : index
    %554 = memref.load %arg2[%c118] : memref<193xf32, #tpu.memory_space<smem>>
    %555 = vector.broadcast %554 : f32 to vector<1x128xf32>
    %556 = arith.mulf %7, %555 : vector<1x128xf32>
    %557 = arith.addf %553, %556 : vector<1x128xf32>
    %cst_34 = arith.constant 0.000000e+00 : f32
    %558 = vector.broadcast %cst_34 : f32 to vector<1x128xf32>
    %559 = arith.maximumf %557, %558 : vector<1x128xf32>
    %c182 = arith.constant 182 : index
    %560 = memref.load %arg2[%c182] : memref<193xf32, #tpu.memory_space<smem>>
    %561 = vector.broadcast %560 : f32 to vector<1x128xf32>
    %562 = arith.mulf %559, %561 : vector<1x128xf32>
    %563 = arith.addf %539, %562 : vector<1x128xf32>
    %c23 = arith.constant 23 : index
    %564 = memref.load %arg2[%c23] : memref<193xf32, #tpu.memory_space<smem>>
    %565 = vector.broadcast %564 : f32 to vector<1x128xf32>
    %566 = arith.mulf %1, %565 : vector<1x128xf32>
    %c151 = arith.constant 151 : index
    %567 = memref.load %arg2[%c151] : memref<193xf32, #tpu.memory_space<smem>>
    %568 = vector.broadcast %567 : f32 to vector<1x128xf32>
    %569 = arith.addf %566, %568 : vector<1x128xf32>
    %c55 = arith.constant 55 : index
    %570 = memref.load %arg2[%c55] : memref<193xf32, #tpu.memory_space<smem>>
    %571 = vector.broadcast %570 : f32 to vector<1x128xf32>
    %572 = arith.mulf %3, %571 : vector<1x128xf32>
    %573 = arith.addf %569, %572 : vector<1x128xf32>
    %c87 = arith.constant 87 : index
    %574 = memref.load %arg2[%c87] : memref<193xf32, #tpu.memory_space<smem>>
    %575 = vector.broadcast %574 : f32 to vector<1x128xf32>
    %576 = arith.mulf %5, %575 : vector<1x128xf32>
    %577 = arith.addf %573, %576 : vector<1x128xf32>
    %c119 = arith.constant 119 : index
    %578 = memref.load %arg2[%c119] : memref<193xf32, #tpu.memory_space<smem>>
    %579 = vector.broadcast %578 : f32 to vector<1x128xf32>
    %580 = arith.mulf %7, %579 : vector<1x128xf32>
    %581 = arith.addf %577, %580 : vector<1x128xf32>
    %cst_35 = arith.constant 0.000000e+00 : f32
    %582 = vector.broadcast %cst_35 : f32 to vector<1x128xf32>
    %583 = arith.maximumf %581, %582 : vector<1x128xf32>
    %c183 = arith.constant 183 : index
    %584 = memref.load %arg2[%c183] : memref<193xf32, #tpu.memory_space<smem>>
    %585 = vector.broadcast %584 : f32 to vector<1x128xf32>
    %586 = arith.mulf %583, %585 : vector<1x128xf32>
    %587 = arith.addf %563, %586 : vector<1x128xf32>
    %c24 = arith.constant 24 : index
    %588 = memref.load %arg2[%c24] : memref<193xf32, #tpu.memory_space<smem>>
    %589 = vector.broadcast %588 : f32 to vector<1x128xf32>
    %590 = arith.mulf %1, %589 : vector<1x128xf32>
    %c152 = arith.constant 152 : index
    %591 = memref.load %arg2[%c152] : memref<193xf32, #tpu.memory_space<smem>>
    %592 = vector.broadcast %591 : f32 to vector<1x128xf32>
    %593 = arith.addf %590, %592 : vector<1x128xf32>
    %c56 = arith.constant 56 : index
    %594 = memref.load %arg2[%c56] : memref<193xf32, #tpu.memory_space<smem>>
    %595 = vector.broadcast %594 : f32 to vector<1x128xf32>
    %596 = arith.mulf %3, %595 : vector<1x128xf32>
    %597 = arith.addf %593, %596 : vector<1x128xf32>
    %c88 = arith.constant 88 : index
    %598 = memref.load %arg2[%c88] : memref<193xf32, #tpu.memory_space<smem>>
    %599 = vector.broadcast %598 : f32 to vector<1x128xf32>
    %600 = arith.mulf %5, %599 : vector<1x128xf32>
    %601 = arith.addf %597, %600 : vector<1x128xf32>
    %c120 = arith.constant 120 : index
    %602 = memref.load %arg2[%c120] : memref<193xf32, #tpu.memory_space<smem>>
    %603 = vector.broadcast %602 : f32 to vector<1x128xf32>
    %604 = arith.mulf %7, %603 : vector<1x128xf32>
    %605 = arith.addf %601, %604 : vector<1x128xf32>
    %cst_36 = arith.constant 0.000000e+00 : f32
    %606 = vector.broadcast %cst_36 : f32 to vector<1x128xf32>
    %607 = arith.maximumf %605, %606 : vector<1x128xf32>
    %c184 = arith.constant 184 : index
    %608 = memref.load %arg2[%c184] : memref<193xf32, #tpu.memory_space<smem>>
    %609 = vector.broadcast %608 : f32 to vector<1x128xf32>
    %610 = arith.mulf %607, %609 : vector<1x128xf32>
    %611 = arith.addf %587, %610 : vector<1x128xf32>
    %c25 = arith.constant 25 : index
    %612 = memref.load %arg2[%c25] : memref<193xf32, #tpu.memory_space<smem>>
    %613 = vector.broadcast %612 : f32 to vector<1x128xf32>
    %614 = arith.mulf %1, %613 : vector<1x128xf32>
    %c153 = arith.constant 153 : index
    %615 = memref.load %arg2[%c153] : memref<193xf32, #tpu.memory_space<smem>>
    %616 = vector.broadcast %615 : f32 to vector<1x128xf32>
    %617 = arith.addf %614, %616 : vector<1x128xf32>
    %c57 = arith.constant 57 : index
    %618 = memref.load %arg2[%c57] : memref<193xf32, #tpu.memory_space<smem>>
    %619 = vector.broadcast %618 : f32 to vector<1x128xf32>
    %620 = arith.mulf %3, %619 : vector<1x128xf32>
    %621 = arith.addf %617, %620 : vector<1x128xf32>
    %c89 = arith.constant 89 : index
    %622 = memref.load %arg2[%c89] : memref<193xf32, #tpu.memory_space<smem>>
    %623 = vector.broadcast %622 : f32 to vector<1x128xf32>
    %624 = arith.mulf %5, %623 : vector<1x128xf32>
    %625 = arith.addf %621, %624 : vector<1x128xf32>
    %c121 = arith.constant 121 : index
    %626 = memref.load %arg2[%c121] : memref<193xf32, #tpu.memory_space<smem>>
    %627 = vector.broadcast %626 : f32 to vector<1x128xf32>
    %628 = arith.mulf %7, %627 : vector<1x128xf32>
    %629 = arith.addf %625, %628 : vector<1x128xf32>
    %cst_37 = arith.constant 0.000000e+00 : f32
    %630 = vector.broadcast %cst_37 : f32 to vector<1x128xf32>
    %631 = arith.maximumf %629, %630 : vector<1x128xf32>
    %c185 = arith.constant 185 : index
    %632 = memref.load %arg2[%c185] : memref<193xf32, #tpu.memory_space<smem>>
    %633 = vector.broadcast %632 : f32 to vector<1x128xf32>
    %634 = arith.mulf %631, %633 : vector<1x128xf32>
    %635 = arith.addf %611, %634 : vector<1x128xf32>
    %c26 = arith.constant 26 : index
    %636 = memref.load %arg2[%c26] : memref<193xf32, #tpu.memory_space<smem>>
    %637 = vector.broadcast %636 : f32 to vector<1x128xf32>
    %638 = arith.mulf %1, %637 : vector<1x128xf32>
    %c154 = arith.constant 154 : index
    %639 = memref.load %arg2[%c154] : memref<193xf32, #tpu.memory_space<smem>>
    %640 = vector.broadcast %639 : f32 to vector<1x128xf32>
    %641 = arith.addf %638, %640 : vector<1x128xf32>
    %c58 = arith.constant 58 : index
    %642 = memref.load %arg2[%c58] : memref<193xf32, #tpu.memory_space<smem>>
    %643 = vector.broadcast %642 : f32 to vector<1x128xf32>
    %644 = arith.mulf %3, %643 : vector<1x128xf32>
    %645 = arith.addf %641, %644 : vector<1x128xf32>
    %c90 = arith.constant 90 : index
    %646 = memref.load %arg2[%c90] : memref<193xf32, #tpu.memory_space<smem>>
    %647 = vector.broadcast %646 : f32 to vector<1x128xf32>
    %648 = arith.mulf %5, %647 : vector<1x128xf32>
    %649 = arith.addf %645, %648 : vector<1x128xf32>
    %c122 = arith.constant 122 : index
    %650 = memref.load %arg2[%c122] : memref<193xf32, #tpu.memory_space<smem>>
    %651 = vector.broadcast %650 : f32 to vector<1x128xf32>
    %652 = arith.mulf %7, %651 : vector<1x128xf32>
    %653 = arith.addf %649, %652 : vector<1x128xf32>
    %cst_38 = arith.constant 0.000000e+00 : f32
    %654 = vector.broadcast %cst_38 : f32 to vector<1x128xf32>
    %655 = arith.maximumf %653, %654 : vector<1x128xf32>
    %c186 = arith.constant 186 : index
    %656 = memref.load %arg2[%c186] : memref<193xf32, #tpu.memory_space<smem>>
    %657 = vector.broadcast %656 : f32 to vector<1x128xf32>
    %658 = arith.mulf %655, %657 : vector<1x128xf32>
    %659 = arith.addf %635, %658 : vector<1x128xf32>
    %c27 = arith.constant 27 : index
    %660 = memref.load %arg2[%c27] : memref<193xf32, #tpu.memory_space<smem>>
    %661 = vector.broadcast %660 : f32 to vector<1x128xf32>
    %662 = arith.mulf %1, %661 : vector<1x128xf32>
    %c155 = arith.constant 155 : index
    %663 = memref.load %arg2[%c155] : memref<193xf32, #tpu.memory_space<smem>>
    %664 = vector.broadcast %663 : f32 to vector<1x128xf32>
    %665 = arith.addf %662, %664 : vector<1x128xf32>
    %c59 = arith.constant 59 : index
    %666 = memref.load %arg2[%c59] : memref<193xf32, #tpu.memory_space<smem>>
    %667 = vector.broadcast %666 : f32 to vector<1x128xf32>
    %668 = arith.mulf %3, %667 : vector<1x128xf32>
    %669 = arith.addf %665, %668 : vector<1x128xf32>
    %c91 = arith.constant 91 : index
    %670 = memref.load %arg2[%c91] : memref<193xf32, #tpu.memory_space<smem>>
    %671 = vector.broadcast %670 : f32 to vector<1x128xf32>
    %672 = arith.mulf %5, %671 : vector<1x128xf32>
    %673 = arith.addf %669, %672 : vector<1x128xf32>
    %c123 = arith.constant 123 : index
    %674 = memref.load %arg2[%c123] : memref<193xf32, #tpu.memory_space<smem>>
    %675 = vector.broadcast %674 : f32 to vector<1x128xf32>
    %676 = arith.mulf %7, %675 : vector<1x128xf32>
    %677 = arith.addf %673, %676 : vector<1x128xf32>
    %cst_39 = arith.constant 0.000000e+00 : f32
    %678 = vector.broadcast %cst_39 : f32 to vector<1x128xf32>
    %679 = arith.maximumf %677, %678 : vector<1x128xf32>
    %c187 = arith.constant 187 : index
    %680 = memref.load %arg2[%c187] : memref<193xf32, #tpu.memory_space<smem>>
    %681 = vector.broadcast %680 : f32 to vector<1x128xf32>
    %682 = arith.mulf %679, %681 : vector<1x128xf32>
    %683 = arith.addf %659, %682 : vector<1x128xf32>
    %c28 = arith.constant 28 : index
    %684 = memref.load %arg2[%c28] : memref<193xf32, #tpu.memory_space<smem>>
    %685 = vector.broadcast %684 : f32 to vector<1x128xf32>
    %686 = arith.mulf %1, %685 : vector<1x128xf32>
    %c156 = arith.constant 156 : index
    %687 = memref.load %arg2[%c156] : memref<193xf32, #tpu.memory_space<smem>>
    %688 = vector.broadcast %687 : f32 to vector<1x128xf32>
    %689 = arith.addf %686, %688 : vector<1x128xf32>
    %c60 = arith.constant 60 : index
    %690 = memref.load %arg2[%c60] : memref<193xf32, #tpu.memory_space<smem>>
    %691 = vector.broadcast %690 : f32 to vector<1x128xf32>
    %692 = arith.mulf %3, %691 : vector<1x128xf32>
    %693 = arith.addf %689, %692 : vector<1x128xf32>
    %c92 = arith.constant 92 : index
    %694 = memref.load %arg2[%c92] : memref<193xf32, #tpu.memory_space<smem>>
    %695 = vector.broadcast %694 : f32 to vector<1x128xf32>
    %696 = arith.mulf %5, %695 : vector<1x128xf32>
    %697 = arith.addf %693, %696 : vector<1x128xf32>
    %c124 = arith.constant 124 : index
    %698 = memref.load %arg2[%c124] : memref<193xf32, #tpu.memory_space<smem>>
    %699 = vector.broadcast %698 : f32 to vector<1x128xf32>
    %700 = arith.mulf %7, %699 : vector<1x128xf32>
    %701 = arith.addf %697, %700 : vector<1x128xf32>
    %cst_40 = arith.constant 0.000000e+00 : f32
    %702 = vector.broadcast %cst_40 : f32 to vector<1x128xf32>
    %703 = arith.maximumf %701, %702 : vector<1x128xf32>
    %c188 = arith.constant 188 : index
    %704 = memref.load %arg2[%c188] : memref<193xf32, #tpu.memory_space<smem>>
    %705 = vector.broadcast %704 : f32 to vector<1x128xf32>
    %706 = arith.mulf %703, %705 : vector<1x128xf32>
    %707 = arith.addf %683, %706 : vector<1x128xf32>
    %c29 = arith.constant 29 : index
    %708 = memref.load %arg2[%c29] : memref<193xf32, #tpu.memory_space<smem>>
    %709 = vector.broadcast %708 : f32 to vector<1x128xf32>
    %710 = arith.mulf %1, %709 : vector<1x128xf32>
    %c157 = arith.constant 157 : index
    %711 = memref.load %arg2[%c157] : memref<193xf32, #tpu.memory_space<smem>>
    %712 = vector.broadcast %711 : f32 to vector<1x128xf32>
    %713 = arith.addf %710, %712 : vector<1x128xf32>
    %c61 = arith.constant 61 : index
    %714 = memref.load %arg2[%c61] : memref<193xf32, #tpu.memory_space<smem>>
    %715 = vector.broadcast %714 : f32 to vector<1x128xf32>
    %716 = arith.mulf %3, %715 : vector<1x128xf32>
    %717 = arith.addf %713, %716 : vector<1x128xf32>
    %c93 = arith.constant 93 : index
    %718 = memref.load %arg2[%c93] : memref<193xf32, #tpu.memory_space<smem>>
    %719 = vector.broadcast %718 : f32 to vector<1x128xf32>
    %720 = arith.mulf %5, %719 : vector<1x128xf32>
    %721 = arith.addf %717, %720 : vector<1x128xf32>
    %c125 = arith.constant 125 : index
    %722 = memref.load %arg2[%c125] : memref<193xf32, #tpu.memory_space<smem>>
    %723 = vector.broadcast %722 : f32 to vector<1x128xf32>
    %724 = arith.mulf %7, %723 : vector<1x128xf32>
    %725 = arith.addf %721, %724 : vector<1x128xf32>
    %cst_41 = arith.constant 0.000000e+00 : f32
    %726 = vector.broadcast %cst_41 : f32 to vector<1x128xf32>
    %727 = arith.maximumf %725, %726 : vector<1x128xf32>
    %c189 = arith.constant 189 : index
    %728 = memref.load %arg2[%c189] : memref<193xf32, #tpu.memory_space<smem>>
    %729 = vector.broadcast %728 : f32 to vector<1x128xf32>
    %730 = arith.mulf %727, %729 : vector<1x128xf32>
    %731 = arith.addf %707, %730 : vector<1x128xf32>
    %c30 = arith.constant 30 : index
    %732 = memref.load %arg2[%c30] : memref<193xf32, #tpu.memory_space<smem>>
    %733 = vector.broadcast %732 : f32 to vector<1x128xf32>
    %734 = arith.mulf %1, %733 : vector<1x128xf32>
    %c158 = arith.constant 158 : index
    %735 = memref.load %arg2[%c158] : memref<193xf32, #tpu.memory_space<smem>>
    %736 = vector.broadcast %735 : f32 to vector<1x128xf32>
    %737 = arith.addf %734, %736 : vector<1x128xf32>
    %c62 = arith.constant 62 : index
    %738 = memref.load %arg2[%c62] : memref<193xf32, #tpu.memory_space<smem>>
    %739 = vector.broadcast %738 : f32 to vector<1x128xf32>
    %740 = arith.mulf %3, %739 : vector<1x128xf32>
    %741 = arith.addf %737, %740 : vector<1x128xf32>
    %c94 = arith.constant 94 : index
    %742 = memref.load %arg2[%c94] : memref<193xf32, #tpu.memory_space<smem>>
    %743 = vector.broadcast %742 : f32 to vector<1x128xf32>
    %744 = arith.mulf %5, %743 : vector<1x128xf32>
    %745 = arith.addf %741, %744 : vector<1x128xf32>
    %c126 = arith.constant 126 : index
    %746 = memref.load %arg2[%c126] : memref<193xf32, #tpu.memory_space<smem>>
    %747 = vector.broadcast %746 : f32 to vector<1x128xf32>
    %748 = arith.mulf %7, %747 : vector<1x128xf32>
    %749 = arith.addf %745, %748 : vector<1x128xf32>
    %cst_42 = arith.constant 0.000000e+00 : f32
    %750 = vector.broadcast %cst_42 : f32 to vector<1x128xf32>
    %751 = arith.maximumf %749, %750 : vector<1x128xf32>
    %c190 = arith.constant 190 : index
    %752 = memref.load %arg2[%c190] : memref<193xf32, #tpu.memory_space<smem>>
    %753 = vector.broadcast %752 : f32 to vector<1x128xf32>
    %754 = arith.mulf %751, %753 : vector<1x128xf32>
    %755 = arith.addf %731, %754 : vector<1x128xf32>
    %c31 = arith.constant 31 : index
    %756 = memref.load %arg2[%c31] : memref<193xf32, #tpu.memory_space<smem>>
    %757 = vector.broadcast %756 : f32 to vector<1x128xf32>
    %758 = arith.mulf %1, %757 : vector<1x128xf32>
    %c159 = arith.constant 159 : index
    %759 = memref.load %arg2[%c159] : memref<193xf32, #tpu.memory_space<smem>>
    %760 = vector.broadcast %759 : f32 to vector<1x128xf32>
    %761 = arith.addf %758, %760 : vector<1x128xf32>
    %c63 = arith.constant 63 : index
    %762 = memref.load %arg2[%c63] : memref<193xf32, #tpu.memory_space<smem>>
    %763 = vector.broadcast %762 : f32 to vector<1x128xf32>
    %764 = arith.mulf %3, %763 : vector<1x128xf32>
    %765 = arith.addf %761, %764 : vector<1x128xf32>
    %c95 = arith.constant 95 : index
    %766 = memref.load %arg2[%c95] : memref<193xf32, #tpu.memory_space<smem>>
    %767 = vector.broadcast %766 : f32 to vector<1x128xf32>
    %768 = arith.mulf %5, %767 : vector<1x128xf32>
    %769 = arith.addf %765, %768 : vector<1x128xf32>
    %c127 = arith.constant 127 : index
    %770 = memref.load %arg2[%c127] : memref<193xf32, #tpu.memory_space<smem>>
    %771 = vector.broadcast %770 : f32 to vector<1x128xf32>
    %772 = arith.mulf %7, %771 : vector<1x128xf32>
    %773 = arith.addf %769, %772 : vector<1x128xf32>
    %cst_43 = arith.constant 0.000000e+00 : f32
    %774 = vector.broadcast %cst_43 : f32 to vector<1x128xf32>
    %775 = arith.maximumf %773, %774 : vector<1x128xf32>
    %c191 = arith.constant 191 : index
    %776 = memref.load %arg2[%c191] : memref<193xf32, #tpu.memory_space<smem>>
    %777 = vector.broadcast %776 : f32 to vector<1x128xf32>
    %778 = arith.mulf %775, %777 : vector<1x128xf32>
    %779 = arith.addf %755, %778 : vector<1x128xf32>
    %c0_44 = arith.constant 0 : index
    %c0_45 = arith.constant 0 : index
    %c0_46 = arith.constant 0 : index
    %780 = vector.load %arg3[%c0_44, %c0_45, %c0_46] : memref<1x1x128xf32, #tpu.memory_space<vmem>>, vector<1x1x128xf32>
    %781 = vector.shape_cast %780 : vector<1x1x128xf32> to vector<1x128xf32>
    %782 = vector.shape_cast %779 : vector<1x128xf32> to vector<1x1x128xf32>
    tpu.vector_store %arg3[%c0_44, %c0_45, %c0_46], %782 {strides = array<i32>} : memref<1x1x128xf32, #tpu.memory_space<vmem>>, vector<1x1x128xf32>,
    return
  }
  func.func @transform_0(%arg0: i32) -> (i32, i32, i32) {
    %c0_i32 = arith.constant 0 : i32
    %c0_i32_0 = arith.constant 0 : i32
    %c0_i32_1 = arith.constant 0 : i32
    return %c0_i32, %arg0, %c0_i32_0 : i32, i32, i32
  }
  func.func @transform_1(%arg0: i32) -> i32 {
    %c0_i32 = arith.constant 0 : i32
    %c0_i32_0 = arith.constant 0 : i32
    return %c0_i32 : i32
  }
  func.func @transform_2(%arg0: i32) -> (i32, i32, i32) {
    %c0_i32 = arith.constant 0 : i32
    %c0_i32_0 = arith.constant 0 : i32
    %c0_i32_1 = arith.constant 0 : i32
    return %c0_i32, %arg0, %c0_i32_0 : i32, i32, i32
  }
}

</mosaic_0001>

<bundles_post_ra>
// kernel: ventas_nn_forward.1
= control target key start
LH: loop header
LB: loop body
LE: loop exit
PB: predicated region body
PF: predicated region fallthrough
CT: control target
= control target key end

     0   :  { %7 = vsyncpa [#allocation3], 0  ;;  %s1743_s0 = inlined_call_operand.vmem [shape: f32[4,1,128], index: 0, kind: input, shape index: {}]   ;;  %s1744_s1 = inlined_call_operand.vmem [shape: f32[193], index: 1, kind: input, shape index: {}]   ;;  %s1745_s2 = inlined_call_operand.vmem [shape: f32[1,1,128], index: 2, kind: output, shape index: {}]  }
   0x1   :  { %s16_s11 = sshll.u32 %s1744_s1, 4  ;;  %s17_s11 = int_to_ptr.vmem [resolvable:$true] %s16_s11 }
   0x2   :  { %s976_s12 = scalar_lea.vmem %s17_s11, 32  ;;  %p981_p1 = scmp.lt.s32.totalorder %s17_s11, %s17_s11 }
   0x3   :  { %p977_p0 = scmp.ne.s32.totalorder %s17_s11, %s976_s12  ;;  %p982_p2 = scmp.lt.s32.totalorder %s976_s12, %s976_s12 }
   0x5   :  { %p983_p3 = por %p982_p2, %p981_p1 }
   0x7   :  { %p984_p4 = pnand %p983_p3, %p977_p0 }
   0x9   :  { %987 = shalt.err (!%p984_p4)
}
   0xa   :  { %s990_s13 = smov [#allocation2]  }
   0xb   :  { %19 = dma.vmem_to_smem %s17_s11, 32, %s990_s13, [#allocation3]  }
   0xc   :  { %988 = dma.done.wait [#allocation3], 32  }
   0xd   :  { %989 = vsyncadd [#allocation3], 4294967264 }
   0xe   :  { %23 = sfence }
   0xf   :  { %s1009_s14 = sld [smem:[#allocation2 + $0xc0]]  ;;  %s1013_s20 = sld [smem:[#allocation2 + $0x1]]  ;;  %v1018_v0 = vld [vmem:[%s1743_s0] sm:$0x1]  ;;  %v1027_v1 = vld [vmem:[%s1743_s0 + $0x1] sm:$0x1] }
  0x10   :  { %s34_s15 = sld [smem:[#allocation2]]  ;;  %s1020_s23 = sld [smem:[#allocation2 + $0x81]]  ;;  %v1036_v2 = vld [vmem:[%s1743_s0 + $0x2] sm:$0x1]  ;;  %v1045_v4 = vld [vmem:[%s1743_s0 + $0x3] sm:$0x1] }
  0x11   :  { %s780_s16 = sld [smem:[#allocation2 + $0x80]]  ;;  %s1022_s24 = sld [smem:[#allocation2 + $0x21]] }
  0x12   :  { %s781_s17 = sld [smem:[#allocation2 + $0x20]]  ;;  %s1029_s27 = sld [smem:[#allocation2 + $0x41]] }
  0x13   :  { %s782_s18 = sld [smem:[#allocation2 + $0x40]]  ;;  %s1031_s28 = sld [smem:[#allocation2 + $0x61]] }
  0x14   :  { %s783_s1 = sld [smem:[#allocation2 + $0x60]]  ;;  %s1038_s3 = sld [smem:[#allocation2 + $0xa1]] }
  0x15   :  { %s1011_s19 = sld [smem:[#allocation2 + $0xa0]]  ;;  %s1040_s4 = sld [smem:[#allocation2 + $0x2]]  ;;  %v32_v11 = vstv %s1009_s14  ;;  %v58_v15 = vstv %s1013_s20 }
  0x16   :  { %v35_v3 = vstv %s34_s15  ;;  %s1048_s7 = sld [smem:[#allocation2 + $0x82]]  ;;  %s1059_s11 = sld [smem:[#allocation2 + $0x3]]  ;;  %v61_v16 = vstv %s1020_s23  ;;  %v59_v19 = vmul.f32 %v58_v15, %v1018_v0 }
  0x17   :  { %v36_v5 = vmul.f32 %v35_v3, %v1018_v0  ;;  %v38_v6 = vstv %s780_s16  ;;  %s1050_s8 = sld [smem:[#allocation2 + $0x22]]  ;;  %v64_v17 = vstv %s1022_s24  ;;  %s1065_s12 = sld [smem:[#allocation2 + $0x83]] }
  0x18   :  { %v41_v7 = vstv %s781_s17  ;;  %s1053_s9 = sld [smem:[#allocation2 + $0x42]]  ;;  %s1067_s13 = sld [smem:[#allocation2 + $0x23]]  ;;  %v65_v20 = vmul.f32 %v1027_v1, %v64_v17  ;;  %v68_v21 = vstv %s1029_s27  ;;  %v62_v27 = vadd.f32 %v61_v16, %v59_v19 }
  0x19   :  { %v42_v8 = vmul.f32 %v1027_v1, %v41_v7  ;;  %v45_v9 = vstv %s782_s18  ;;  %s1055_s10 = sld [smem:[#allocation2 + $0x62]]  ;;  %v39_v12 = vadd.f32 %v38_v6, %v36_v5  ;;  %s1072_s15 = sld [smem:[#allocation2 + $0x43]]  ;;  %v69_v23 = vmul.f32 %v1036_v2, %v68_v21 }
  0x1a   :  { %v49_v10 = vstv %s783_s1  ;;  %v46_v13 = vmul.f32 %v1036_v2, %v45_v9  ;;  %s1074_s16 = sld [smem:[#allocation2 + $0x63]]  ;;  %v72_v24 = vstv %s1031_s28  ;;  %s1080_s17 = sld [smem:[#allocation2 + $0xa2]]  ;;  %v66_v35 = vadd.f32 %v65_v20, %v62_v27 }
  0x1b   :  { %v50_v14 = vmul.f32 %v1045_v4, %v49_v10  ;;  %v43_v18 = vadd.f32 %v42_v8, %v39_v12  ;;  %v54_v22 = vstv %s1011_s19  ;;  %v81_v25 = vstv %s1040_s4  ;;  %s1084_s18 = sld [smem:[#allocation2 + $0x4]]  ;;  %s1104_s22 = sld [smem:[#allocation2 + $0xa3]] }
  0x1c   :  { %v73_v28 = vmul.f32 %v1045_v4, %v72_v24  ;;  %v82_v29 = vmul.f32 %v81_v25, %v1018_v0  ;;  %v84_v30 = vstv %s1048_s7  ;;  %s1090_s1 = sld [smem:[#allocation2 + $0x84]]  ;;  %v77_v38 = vstv %s1038_s3  ;;  %s1112_s24 = sld [smem:[#allocation2 + $0x5]] }
  0x1d   :  { %v47_v26 = vadd.f32 %v46_v13, %v43_v18  ;;  %v87_v31 = vstv %s1050_s8  ;;  %s1092_s19 = sld [smem:[#allocation2 + $0x24]]  ;;  %v104_v41 = vstv %s1059_s11  ;;  %v70_v43 = vadd.f32 %v69_v23, %v66_v35  ;;  %s1114_s25 = sld [smem:[#allocation2 + $0x85]] }
  0x1e   :  { %v91_v32 = vstv %s1053_s9  ;;  %v85_v36 = vadd.f32 %v84_v30, %v82_v29  ;;  %v88_v37 = vmul.f32 %v1027_v1, %v87_v31  ;;  %s1095_s20 = sld [smem:[#allocation2 + $0x44]]  ;;  %v105_v45 = vmul.f32 %v104_v41, %v1018_v0  ;;  %s1116_s26 = sld [smem:[#allocation2 + $0x25]] }
  0x1f   :  { %v95_v33 = vstv %s1055_s10  ;;  %v51_v34 = vadd.f32 %v50_v14, %v47_v26  ;;  %v92_v39 = vmul.f32 %v1036_v2, %v91_v32  ;;  %s1101_s21 = sld [smem:[#allocation2 + $0x64]]  ;;  %v107_v46 = vstv %s1065_s12  ;;  %s1118_s27 = sld [smem:[#allocation2 + $0x45]] }
  0x20   :  { %v96_v40 = vmul.f32 %v1045_v4, %v95_v33  ;;  %v89_v44 = vadd.f32 %v88_v37, %v85_v36  ;;  %s1106_s23 = sld [smem:[#allocation2 + $0xa4]]  ;;  %v110_v47 = vstv %s1067_s13  ;;  %v114_v48 = vstv %s1072_s15  ;;  %s1127_s28 = sld [smem:[#allocation2 + $0x65]] }
  0x21   :  { %v52_v42 = vmax.f32 %v51_v34, 0.0  ;;  %v118_v49 = vstv %s1074_s16  ;;  %v74_v51 = vadd.f32 %v73_v28, %v70_v43  ;;  %v108_v53 = vadd.f32 %v107_v46, %v105_v45  ;;  %s1129_s29 = sld [smem:[#allocation2 + $0x6]]  ;;  %s1146_s4 = sld [smem:[#allocation2 + $0xa5]] }
  0x22   :  { %v93_v52 = vadd.f32 %v92_v39, %v89_v44  ;;  %v100_v54 = vstv %s1080_s17  ;;  %v111_v55 = vmul.f32 %v1027_v1, %v110_v47  ;;  %v115_v56 = vmul.f32 %v1036_v2, %v114_v48  ;;  %s1134_s30 = sld [smem:[#allocation2 + $0x86]]  ;;  %s1152_s6 = sld [smem:[#allocation2 + $0x7]] }
  0x23   :  { %v55_v50 = vmul.f32 %v54_v22, %v52_v42  ;;  %v119_v57 = vmul.f32 %v1045_v4, %v118_v49  ;;  %v75_v59 = vmax.f32 %v74_v51, 0.0  ;;  %v127_v61 = vstv %s1084_s18  ;;  %s1138_s14 = sld [smem:[#allocation2 + $0x26]]  ;;  %s1158_s7 = sld [smem:[#allocation2 + $0x87]] }
  0x24   :  { %v97_v60 = vadd.f32 %v96_v40, %v93_v52  ;;  %v112_v62 = vadd.f32 %v111_v55, %v108_v53  ;;  %v128_v63 = vmul.f32 %v127_v61, %v1018_v0  ;;  %v130_v3 = vstv %s1090_s1  ;;  %s1140_s3 = sld [smem:[#allocation2 + $0x46]]  ;;  %s1160_s8 = sld [smem:[#allocation2 + $0x27]] }
  0x25   :  { %v56_v58 = vadd.f32 %v55_v50, %v32_v11  ;;  %v133_v5 = vstv %s1092_s19  ;;  %v78_v6 = vmul.f32 %v77_v38, %v75_v59  ;;  %v137_v9 = vstv %s1095_s20  ;;  %s1148_s5 = sld [smem:[#allocation2 + $0x66]]  ;;  %s1163_s9 = sld [smem:[#allocation2 + $0x47]] }
  0x26   :  { %v98_v7 = vmax.f32 %v97_v60, 0.0  ;;  %v134_v8 = vmul.f32 %v1027_v1, %v133_v5  ;;  %v116_v10 = vadd.f32 %v115_v56, %v112_v62  ;;  %v131_v11 = vadd.f32 %v130_v3, %v128_v63  ;;  %s1168_s10 = sld [smem:[#allocation2 + $0x67]]  ;;  %s1172_s11 = sld [smem:[#allocation2 + $0xa6]] }
  0x27   :  { %v138_v12 = vmul.f32 %v1036_v2, %v137_v9  ;;  %v141_v13 = vstv %s1101_s21  ;;  %v79_v14 = vadd.f32 %v78_v6, %v56_v58  ;;  %v123_v16 = vstv %s1104_s22  ;;  %s1174_s12 = sld [smem:[#allocation2 + $0x8]]  ;;  %s1193_s18 = sld [smem:[#allocation2 + $0xa7]] }
  0x28   :  { %v101_v15 = vmul.f32 %v100_v54, %v98_v7  ;;  %v142_v17 = vmul.f32 %v1045_v4, %v141_v13  ;;  %v120_v18 = vadd.f32 %v119_v57, %v116_v10  ;;  %v135_v19 = vadd.f32 %v134_v8, %v131_v11  ;;  %s1179_s13 = sld [smem:[#allocation2 + $0x88]]  ;;  %s1200_s19 = sld [smem:[#allocation2 + $0x9]] }
  0x29   :  { %v150_v20 = vstv %s1112_s24  ;;  %v153_v21 = vstv %s1114_s25  ;;  %v146_v22 = vstv %s1106_s23  ;;  %v156_v24 = vstv %s1116_s26  ;;  %s1181_s15 = sld [smem:[#allocation2 + $0x28]]  ;;  %s1202_s20 = sld [smem:[#allocation2 + $0x89]] }
  0x2a   :  { %v151_v23 = vmul.f32 %v150_v20, %v1018_v0  ;;  %v160_v25 = vstv %s1118_s27  ;;  %v102_v26 = vadd.f32 %v101_v15, %v79_v14  ;;  %v121_v27 = vmax.f32 %v120_v18, 0.0  ;;  %s1184_s16 = sld [smem:[#allocation2 + $0x48]]  ;;  %s1206_s21 = sld [smem:[#allocation2 + $0x29]] }
  0x2b   :  { %v139_v28 = vadd.f32 %v138_v12, %v135_v19  ;;  %v157_v29 = vmul.f32 %v1027_v1, %v156_v24  ;;  %v161_v31 = vmul.f32 %v1036_v2, %v160_v25  ;;  %v164_v32 = vstv %s1127_s28  ;;  %s1186_s17 = sld [smem:[#allocation2 + $0x68]]  ;;  %s1208_s22 = sld [smem:[#allocation2 + $0x49]] }
  0x2c   :  { %v154_v30 = vadd.f32 %v153_v21, %v151_v23  ;;  %v173_v33 = vstv %s1129_s29  ;;  %v124_v34 = vmul.f32 %v123_v16, %v121_v27  ;;  %v165_v36 = vmul.f32 %v1045_v4, %v164_v32  ;;  %s1195_s1 = sld [smem:[#allocation2 + $0xa8]]  ;;  %s1215_s23 = sld [smem:[#allocation2 + $0x69]] }
  0x2d   :  { %v143_v35 = vadd.f32 %v142_v17, %v139_v28  ;;  %v174_v37 = vmul.f32 %v173_v33, %v1018_v0  ;;  %v176_v39 = vstv %s1134_s30  ;;  %v179_v40 = vstv %s1138_s14  ;;  %s1217_s24 = sld [smem:[#allocation2 + $0xa]]  ;;  %s1234_s28 = sld [smem:[#allocation2 + $0xa9]] }
  0x2e   :  { %v158_v38 = vadd.f32 %v157_v29, %v154_v30  ;;  %v183_v41 = vstv %s1140_s3  ;;  %v125_v42 = vadd.f32 %v124_v34, %v102_v26  ;;  %v180_v45 = vmul.f32 %v1027_v1, %v179_v40  ;;  %s1221_s25 = sld [smem:[#allocation2 + $0x8a]]  ;;  %s1240_s30 = sld [smem:[#allocation2 + $0xb]] }
  0x2f   :  { %v144_v43 = vmax.f32 %v143_v35, 0.0  ;;  %v177_v44 = vadd.f32 %v176_v39, %v174_v37  ;;  %v169_v47 = vstv %s1146_s4  ;;  %v184_v48 = vmul.f32 %v1036_v2, %v183_v41  ;;  %s1226_s26 = sld [smem:[#allocation2 + $0x2a]]  ;;  %s1246_s14 = sld [smem:[#allocation2 + $0x8b]] }
  0x30   :  { %v162_v46 = vadd.f32 %v161_v31, %v158_v38  ;;  %v187_v49 = vstv %s1148_s5  ;;  %v196_v53 = vstv %s1152_s6  ;;  %v199_v56 = vstv %s1158_s7  ;;  %s1228_s27 = sld [smem:[#allocation2 + $0x4a]]  ;;  %s1248_s3 = sld [smem:[#allocation2 + $0x2b]] }
  0x31   :  { %v147_v50 = vmul.f32 %v146_v22, %v144_v43  ;;  %v181_v51 = vadd.f32 %v180_v45, %v177_v44  ;;  %v188_v52 = vmul.f32 %v1045_v4, %v187_v49  ;;  %v197_v55 = vmul.f32 %v196_v53, %v1018_v0  ;;  %s1236_s29 = sld [smem:[#allocation2 + $0x6a]]  ;;  %s1251_s4 = sld [smem:[#allocation2 + $0x4b]] }
  0x32   :  { %v166_v54 = vadd.f32 %v165_v36, %v162_v46  ;;  %v202_v57 = vstv %s1160_s8  ;;  %v206_v61 = vstv %s1163_s9  ;;  %v210_v5 = vstv %s1168_s10  ;;  %s1256_s5 = sld [smem:[#allocation2 + $0x6b]]  ;;  %s1260_s6 = sld [smem:[#allocation2 + $0xaa]] }
  0x33   :  { %v148_v58 = vadd.f32 %v147_v50, %v125_v42  ;;  %v185_v59 = vadd.f32 %v184_v48, %v181_v51  ;;  %v203_v60 = vmul.f32 %v1027_v1, %v202_v57  ;;  %v200_v63 = vadd.f32 %v199_v56, %v197_v55  ;;  %s1262_s7 = sld [smem:[#allocation2 + $0xc]] }
  0x34   :  { %v167_v62 = vmax.f32 %v166_v54, 0.0  ;;  %v207_v3 = vmul.f32 %v1036_v2, %v206_v61  ;;  %v192_v7 = vstv %s1172_s11  ;;  %v211_v8 = vmul.f32 %v1045_v4, %v210_v5  ;;  %s1267_s8 = sld [smem:[#allocation2 + $0x8c]] }
  0x35   :  { %v189_v6 = vadd.f32 %v188_v52, %v185_v59  ;;  %v219_v9 = vstv %s1174_s12  ;;  %v204_v11 = vadd.f32 %v203_v60, %v200_v63  ;;  %v222_v13 = vstv %s1179_s13  ;;  %s1269_s9 = sld [smem:[#allocation2 + $0x2c]]  ;;  %s1281_s12 = sld [smem:[#allocation2 + $0xab]] }
  0x36   :  { %v170_v10 = vmul.f32 %v169_v47, %v167_v62  ;;  %v220_v12 = vmul.f32 %v219_v9, %v1018_v0  ;;  %v225_v15 = vstv %s1181_s15  ;;  %v229_v16 = vstv %s1184_s16  ;;  %s1272_s10 = sld [smem:[#allocation2 + $0x4c]]  ;;  %s1288_s15 = sld [smem:[#allocation2 + $0xd]] }
  0x37   :  { %v190_v14 = vmax.f32 %v189_v6, 0.0  ;;  %v233_v17 = vstv %s1186_s17  ;;  %v208_v19 = vadd.f32 %v207_v3, %v204_v11  ;;  %v226_v21 = vmul.f32 %v1027_v1, %v225_v15  ;;  %s1274_s11 = sld [smem:[#allocation2 + $0x6c]]  ;;  %s1290_s16 = sld [smem:[#allocation2 + $0x8d]] }
  0x38   :  { %v171_v18 = vadd.f32 %v170_v10, %v148_v58  ;;  %v223_v20 = vadd.f32 %v222_v13, %v220_v12  ;;  %v215_v23 = vstv %s1193_s18  ;;  %v230_v24 = vmul.f32 %v1036_v2, %v229_v16  ;;  %s1283_s13 = sld [smem:[#allocation2 + $0xac]]  ;;  %s1294_s17 = sld [smem:[#allocation2 + $0x2d]] }
  0x39   :  { %v193_v22 = vmul.f32 %v192_v7, %v190_v14  ;;  %v234_v25 = vmul.f32 %v1045_v4, %v233_v17  ;;  %v212_v26 = vadd.f32 %v211_v8, %v208_v19  ;;  %v242_v28 = vstv %s1200_s19  ;;  %s1296_s18 = sld [smem:[#allocation2 + $0x4d]]  ;;  %s1305_s19 = sld [smem:[#allocation2 + $0xe]] }
  0x3a   :  { %v227_v27 = vadd.f32 %v226_v21, %v223_v20  ;;  %v245_v29 = vstv %s1202_s20  ;;  %v238_v30 = vstv %s1195_s1  ;;  %v243_v31 = vmul.f32 %v242_v28, %v1018_v0  ;;  %s1303_s1 = sld [smem:[#allocation2 + $0x6d]]  ;;  %s1309_s20 = sld [smem:[#allocation2 + $0x8e]] }
  0x3b   :  { %v248_v32 = vstv %s1206_s21  ;;  %v252_v33 = vstv %s1208_s22  ;;  %v194_v34 = vadd.f32 %v193_v22, %v171_v18  ;;  %v213_v35 = vmax.f32 %v212_v26, 0.0  ;;  %s1314_s21 = sld [smem:[#allocation2 + $0x2e]] }
  0x3c   :  { %v231_v36 = vadd.f32 %v230_v24, %v227_v27  ;;  %v249_v37 = vmul.f32 %v1027_v1, %v248_v32  ;;  %v246_v38 = vadd.f32 %v245_v29, %v243_v31  ;;  %v253_v39 = vmul.f32 %v1036_v2, %v252_v33  ;;  %s1316_s22 = sld [smem:[#allocation2 + $0x4e]] }
  0x3d   :  { %v256_v40 = vstv %s1215_s23  ;;  %v265_v41 = vstv %s1217_s24  ;;  %v216_v42 = vmul.f32 %v215_v23, %v213_v35  ;;  %v268_v47 = vstv %s1221_s25  ;;  %s1322_s23 = sld [smem:[#allocation2 + $0xad]]  ;;  %s1324_s24 = sld [smem:[#allocation2 + $0x6e]] }
  0x3e   :  { %v235_v43 = vadd.f32 %v234_v25, %v231_v36  ;;  %v257_v44 = vmul.f32 %v1045_v4, %v256_v40  ;;  %v266_v45 = vmul.f32 %v265_v41, %v1018_v0  ;;  %v250_v46 = vadd.f32 %v249_v37, %v246_v38  ;;  %s1328_s25 = sld [smem:[#allocation2 + $0xf]] }
  0x3f   :  { %v271_v48 = vstv %s1226_s26  ;;  %v275_v49 = vstv %s1228_s27  ;;  %v217_v50 = vadd.f32 %v216_v42, %v194_v34  ;;  %v261_v55 = vstv %s1234_s28  ;;  %s1334_s26 = sld [smem:[#allocation2 + $0x8f]] }
  0x40   :  { %v236_v51 = vmax.f32 %v235_v43, 0.0  ;;  %v269_v52 = vadd.f32 %v268_v47, %v266_v45  ;;  %v272_v53 = vmul.f32 %v1027_v1, %v271_v48  ;;  %v254_v54 = vadd.f32 %v253_v39, %v250_v46  ;;  %s1336_s27 = sld [smem:[#allocation2 + $0x2f]] }
  0x41   :  { %v276_v56 = vmul.f32 %v1036_v2, %v275_v49  ;;  %v279_v57 = vstv %s1236_s29  ;;  %v288_v61 = vstv %s1240_s30  ;;  %v291_v3 = vstv %s1246_s14  ;;  %s1339_s28 = sld [smem:[#allocation2 + $0x4f]]  ;;  %s1348_s30 = sld [smem:[#allocation2 + $0xae]] }
  0x42   :  { %v239_v58 = vmul.f32 %v238_v30, %v236_v51  ;;  %v273_v59 = vadd.f32 %v272_v53, %v269_v52  ;;  %v280_v60 = vmul.f32 %v1045_v4, %v279_v57  ;;  %v258_v62 = vadd.f32 %v257_v44, %v254_v54  ;;  %s1344_s29 = sld [smem:[#allocation2 + $0x6f]]  ;;  %s1350_s14 = sld [smem:[#allocation2 + $0x10]] }
  0x43   :  { %v289_v63 = vmul.f32 %v288_v61, %v1018_v0  ;;  %v294_v5 = vstv %s1248_s3  ;;  %v298_v9 = vstv %s1251_s4  ;;  %v302_v13 = vstv %s1256_s5  ;;  %s1355_s3 = sld [smem:[#allocation2 + $0x90]] }
  0x44   :  { %v240_v6 = vadd.f32 %v239_v58, %v217_v50  ;;  %v277_v7 = vadd.f32 %v276_v56, %v273_v59  ;;  %v295_v8 = vmul.f32 %v1027_v1, %v294_v5  ;;  %v259_v10 = vmax.f32 %v258_v62, 0.0  ;;  %s1357_s4 = sld [smem:[#allocation2 + $0x30]] }
  0x45   :  { %v292_v11 = vadd.f32 %v291_v3, %v289_v63  ;;  %v299_v12 = vmul.f32 %v1036_v2, %v298_v9  ;;  %v284_v15 = vstv %s1260_s6  ;;  %v303_v16 = vmul.f32 %v1045_v4, %v302_v13  ;;  %s1360_s5 = sld [smem:[#allocation2 + $0x50]] }
  0x46   :  { %v281_v14 = vadd.f32 %v280_v60, %v277_v7  ;;  %v311_v17 = vstv %s1262_s7  ;;  %v262_v18 = vmul.f32 %v261_v55, %v259_v10  ;;  %v314_v21 = vstv %s1267_s8  ;;  %s1362_s6 = sld [smem:[#allocation2 + $0x70]]  ;;  %s1369_s7 = sld [smem:[#allocation2 + $0xaf]] }
  0x47   :  { %v296_v19 = vadd.f32 %v295_v8, %v292_v11  ;;  %v312_v20 = vmul.f32 %v311_v17, %v1018_v0  ;;  %v317_v23 = vstv %s1269_s9  ;;  %v321_v24 = vstv %s1272_s10  ;;  %s1371_s8 = sld [smem:[#allocation2 + $0xb0]]  ;;  %s1376_s9 = sld [smem:[#allocation2 + $0x11]] }
  0x48   :  { %v282_v22 = vmax.f32 %v281_v14, 0.0  ;;  %v325_v25 = vstv %s1274_s11  ;;  %v263_v26 = vadd.f32 %v262_v18, %v240_v6  ;;  %v318_v29 = vmul.f32 %v1027_v1, %v317_v23  ;;  %s1378_s10 = sld [smem:[#allocation2 + $0x91]] }
  0x49   :  { %v300_v27 = vadd.f32 %v299_v12, %v296_v19  ;;  %v315_v28 = vadd.f32 %v314_v21, %v312_v20  ;;  %v307_v31 = vstv %s1281_s12  ;;  %v322_v32 = vmul.f32 %v1036_v2, %v321_v24  ;;  %s1382_s11 = sld [smem:[#allocation2 + $0x31]] }
  0x4a   :  { %v285_v30 = vmul.f32 %v284_v15, %v282_v22  ;;  %v326_v33 = vmul.f32 %v1045_v4, %v325_v25  ;;  %v334_v36 = vstv %s1288_s15  ;;  %v337_v37 = vstv %s1290_s16  ;;  %s1384_s12 = sld [smem:[#allocation2 + $0x51]]  ;;  %s1393_s15 = sld [smem:[#allocation2 + $0x12]] }
  0x4b   :  { %v304_v34 = vadd.f32 %v303_v16, %v300_v27  ;;  %v319_v35 = vadd.f32 %v318_v29, %v315_v28  ;;  %v330_v38 = vstv %s1283_s13  ;;  %v335_v39 = vmul.f32 %v334_v36, %v1018_v0  ;;  %s1391_s13 = sld [smem:[#allocation2 + $0x71]]  ;;  %s1397_s16 = sld [smem:[#allocation2 + $0x92]] }
  0x4c   :  { %v340_v40 = vstv %s1294_s17  ;;  %v344_v41 = vstv %s1296_s18  ;;  %v286_v42 = vadd.f32 %v285_v30, %v263_v26  ;;  %v348_v48 = vstv %s1303_s1  ;;  %s1402_s17 = sld [smem:[#allocation2 + $0x32]]  ;;  %s1410_s1 = sld [smem:[#allocation2 + $0xb1]] }
  0x4d   :  { %v305_v43 = vmax.f32 %v304_v34, 0.0  ;;  %v323_v44 = vadd.f32 %v322_v32, %v319_v35  ;;  %v341_v45 = vmul.f32 %v1027_v1, %v340_v40  ;;  %v338_v46 = vadd.f32 %v337_v37, %v335_v39  ;;  %s1404_s18 = sld [smem:[#allocation2 + $0x52]] }
  0x4e   :  { %v345_v47 = vmul.f32 %v1036_v2, %v344_v41  ;;  %v357_v49 = vstv %s1305_s19  ;;  %v349_v52 = vmul.f32 %v1045_v4, %v348_v48  ;;  %v360_v55 = vstv %s1309_s20  ;;  %s1412_s19 = sld [smem:[#allocation2 + $0x72]]  ;;  %s1416_s20 = sld [smem:[#allocation2 + $0x13]] }
  0x4f   :  { %v308_v50 = vmul.f32 %v307_v31, %v305_v43  ;;  %v327_v51 = vadd.f32 %v326_v33, %v323_v44  ;;  %v358_v53 = vmul.f32 %v357_v49, %v1018_v0  ;;  %v342_v54 = vadd.f32 %v341_v45, %v338_v46 }
  0x50   :  { %v363_v56 = vstv %s1314_s21  ;;  %v367_v57 = vstv %s1316_s22  ;;  %v353_v63 = vstv %s1322_s23  ;;  %v371_v5 = vstv %s1324_s24  ;;  %s1422_s21 = sld [smem:[#allocation2 + $0x93]] }
  0x51   :  { %v309_v58 = vadd.f32 %v308_v50, %v286_v42  ;;  %v328_v59 = vmax.f32 %v327_v51, 0.0  ;;  %v361_v60 = vadd.f32 %v360_v55, %v358_v53  ;;  %v364_v61 = vmul.f32 %v1027_v1, %v363_v56  ;;  %s1424_s22 = sld [smem:[#allocation2 + $0x33]] }
  0x52   :  { %v346_v62 = vadd.f32 %v345_v47, %v342_v54  ;;  %v368_v3 = vmul.f32 %v1036_v2, %v367_v57  ;;  %v372_v8 = vmul.f32 %v1045_v4, %v371_v5  ;;  %v380_v9 = vstv %s1328_s25  ;;  %s1427_s23 = sld [smem:[#allocation2 + $0x53]]  ;;  %s1436_s25 = sld [smem:[#allocation2 + $0xb2]] }
  0x53   :  { %v331_v6 = vmul.f32 %v330_v38, %v328_v59  ;;  %v365_v7 = vadd.f32 %v364_v61, %v361_v60  ;;  %v381_v11 = vmul.f32 %v380_v9, %v1018_v0  ;;  %v383_v12 = vstv %s1334_s26  ;;  %s1432_s24 = sld [smem:[#allocation2 + $0x73]]  ;;  %s1438_s26 = sld [smem:[#allocation2 + $0x14]] }
  0x54   :  { %v350_v10 = vadd.f32 %v349_v52, %v346_v62  ;;  %v386_v13 = vstv %s1336_s27  ;;  %v390_v17 = vstv %s1339_s28  ;;  %v394_v21 = vstv %s1344_s29  ;;  %s1443_s27 = sld [smem:[#allocation2 + $0x94]] }
  0x55   :  { %v332_v14 = vadd.f32 %v331_v6, %v309_v58  ;;  %v369_v15 = vadd.f32 %v368_v3, %v365_v7  ;;  %v387_v16 = vmul.f32 %v1027_v1, %v386_v13  ;;  %v384_v19 = vadd.f32 %v383_v12, %v381_v11  ;;  %s1445_s28 = sld [smem:[#allocation2 + $0x34]] }
  0x56   :  { %v351_v18 = vmax.f32 %v350_v10, 0.0  ;;  %v391_v20 = vmul.f32 %v1036_v2, %v390_v17  ;;  %v376_v23 = vstv %s1348_s30  ;;  %v395_v24 = vmul.f32 %v1045_v4, %v394_v21  ;;  %s1448_s29 = sld [smem:[#allocation2 + $0x54]] }
  0x57   :  { %v373_v22 = vadd.f32 %v372_v8, %v369_v15  ;;  %v403_v25 = vstv %s1350_s14  ;;  %v388_v27 = vadd.f32 %v387_v16, %v384_v19  ;;  %v406_v29 = vstv %s1355_s3  ;;  %s1450_s30 = sld [smem:[#allocation2 + $0x74]]  ;;  %s1457_s14 = sld [smem:[#allocation2 + $0xb3]] }
  0x58   :  { %v354_v26 = vmul.f32 %v353_v63, %v351_v18  ;;  %v404_v28 = vmul.f32 %v403_v25, %v1018_v0  ;;  %v409_v31 = vstv %s1357_s4  ;;  %v413_v32 = vstv %s1360_s5  ;;  %s1459_s3 = sld [smem:[#allocation2 + $0xb4]]  ;;  %s1464_s4 = sld [smem:[#allocation2 + $0x15]] }
  0x59   :  { %v374_v30 = vmax.f32 %v373_v22, 0.0  ;;  %v417_v33 = vstv %s1362_s6  ;;  %v392_v35 = vadd.f32 %v391_v20, %v388_v27  ;;  %v410_v37 = vmul.f32 %v1027_v1, %v409_v31  ;;  %s1466_s5 = sld [smem:[#allocation2 + $0x95]] }
  0x5a   :  { %v355_v34 = vadd.f32 %v354_v26, %v332_v14  ;;  %v407_v36 = vadd.f32 %v406_v29, %v404_v28  ;;  %v399_v39 = vstv %s1369_s7  ;;  %v414_v40 = vmul.f32 %v1036_v2, %v413_v32  ;;  %s1470_s6 = sld [smem:[#allocation2 + $0x35]] }
  0x5b   :  { %v377_v38 = vmul.f32 %v376_v23, %v374_v30  ;;  %v418_v41 = vmul.f32 %v1045_v4, %v417_v33  ;;  %v396_v42 = vadd.f32 %v395_v24, %v392_v35  ;;  %v426_v44 = vstv %s1376_s9  ;;  %s1472_s7 = sld [smem:[#allocation2 + $0x55]]  ;;  %s1481_s9 = sld [smem:[#allocation2 + $0x16]] }
  0x5c   :  { %v411_v43 = vadd.f32 %v410_v37, %v407_v36  ;;  %v429_v45 = vstv %s1378_s10  ;;  %v422_v46 = vstv %s1371_s8  ;;  %v427_v47 = vmul.f32 %v426_v44, %v1018_v0  ;;  %s1479_s8 = sld [smem:[#allocation2 + $0x75]]  ;;  %s1485_s10 = sld [smem:[#allocation2 + $0x96]] }
  0x5d   :  { %v432_v48 = vstv %s1382_s11  ;;  %v436_v49 = vstv %s1384_s12  ;;  %v378_v50 = vadd.f32 %v377_v38, %v355_v34  ;;  %v397_v51 = vmax.f32 %v396_v42, 0.0  ;;  %s1490_s11 = sld [smem:[#allocation2 + $0x36]] }
  0x5e   :  { %v415_v52 = vadd.f32 %v414_v40, %v411_v43  ;;  %v433_v53 = vmul.f32 %v1027_v1, %v432_v48  ;;  %v430_v54 = vadd.f32 %v429_v45, %v427_v47  ;;  %v437_v55 = vmul.f32 %v1036_v2, %v436_v49  ;;  %s1492_s12 = sld [smem:[#allocation2 + $0x56]] }
  0x5f   :  { %v440_v56 = vstv %s1391_s13  ;;  %v449_v57 = vstv %s1393_s15  ;;  %v400_v58 = vmul.f32 %v399_v39, %v397_v51  ;;  %v452_v63 = vstv %s1397_s16  ;;  %s1498_s13 = sld [smem:[#allocation2 + $0xb5]]  ;;  %s1500_s15 = sld [smem:[#allocation2 + $0x76]] }
  0x60   :  { %v419_v59 = vadd.f32 %v418_v41, %v415_v52  ;;  %v441_v60 = vmul.f32 %v1045_v4, %v440_v56  ;;  %v450_v61 = vmul.f32 %v449_v57, %v1018_v0  ;;  %v434_v62 = vadd.f32 %v433_v53, %v430_v54  ;;  %s1504_s16 = sld [smem:[#allocation2 + $0x17]] }
  0x61   :  { %v455_v3 = vstv %s1402_s17  ;;  %v459_v5 = vstv %s1404_s18  ;;  %v401_v6 = vadd.f32 %v400_v58, %v378_v50  ;;  %v445_v11 = vstv %s1410_s1  ;;  %s1510_s17 = sld [smem:[#allocation2 + $0x97]] }
  0x62   :  { %v420_v7 = vmax.f32 %v419_v59, 0.0  ;;  %v453_v8 = vadd.f32 %v452_v63, %v450_v61  ;;  %v456_v9 = vmul.f32 %v1027_v1, %v455_v3  ;;  %v438_v10 = vadd.f32 %v437_v55, %v434_v62  ;;  %s1512_s18 = sld [smem:[#allocation2 + $0x37]] }
  0x63   :  { %v460_v12 = vmul.f32 %v1036_v2, %v459_v5  ;;  %v463_v13 = vstv %s1412_s19  ;;  %v472_v17 = vstv %s1416_s20  ;;  %v475_v20 = vstv %s1422_s21  ;;  %s1515_s1 = sld [smem:[#allocation2 + $0x57]]  ;;  %s1524_s20 = sld [smem:[#allocation2 + $0xb6]] }
  0x64   :  { %v423_v14 = vmul.f32 %v422_v46, %v420_v7  ;;  %v457_v15 = vadd.f32 %v456_v9, %v453_v8  ;;  %v464_v16 = vmul.f32 %v1045_v4, %v463_v13  ;;  %v442_v18 = vadd.f32 %v441_v60, %v438_v10  ;;  %s1520_s19 = sld [smem:[#allocation2 + $0x77]]  ;;  %s1526_s21 = sld [smem:[#allocation2 + $0x18]] }
  0x65   :  { %v473_v19 = vmul.f32 %v472_v17, %v1018_v0  ;;  %v478_v21 = vstv %s1424_s22  ;;  %v482_v25 = vstv %s1427_s23  ;;  %v486_v29 = vstv %s1432_s24  ;;  %s1531_s22 = sld [smem:[#allocation2 + $0x98]]  ;;  %v1549_v17 = vld [vmem:[%s1743_s0 + $0x2] sm:$0x1]  ;;  %s1639_s24 = sld [smem:[#allocation2 + $0x9c]] }
  0x66   :  { %v424_v22 = vadd.f32 %v423_v14, %v401_v6  ;;  %v461_v23 = vadd.f32 %v460_v12, %v457_v15  ;;  %v479_v24 = vmul.f32 %v1027_v1, %v478_v21  ;;  %v443_v26 = vmax.f32 %v442_v18, 0.0  ;;  %s1533_s23 = sld [smem:[#allocation2 + $0x38]] }
  0x67   :  { %v476_v27 = vadd.f32 %v475_v20, %v473_v19  ;;  %v483_v28 = vmul.f32 %v1036_v2, %v482_v25  ;;  %v468_v31 = vstv %s1436_s25  ;;  %v487_v32 = vmul.f32 %v1045_v4, %v486_v29  ;;  %s1641_s25 = sld [smem:[#allocation2 + $0x3c]] }
  0x68   :  { %v465_v30 = vadd.f32 %v464_v16, %v461_v23  ;;  %v495_v33 = vstv %s1438_s26  ;;  %v446_v34 = vmul.f32 %v445_v11, %v443_v26  ;;  %v498_v37 = vstv %s1443_s27  ;;  %s1541_s26 = sld [smem:[#allocation2 + $0x58]]  ;;  %v1567_v26 = vld [vmem:[%s1743_s0] sm:$0x1] }
  0x69   :  { %v480_v35 = vadd.f32 %v479_v24, %v476_v27  ;;  %v496_v36 = vmul.f32 %v495_v33, %v1018_v0  ;;  %v501_v39 = vstv %s1445_s28  ;;  %v505_v40 = vstv %s1448_s29  ;;  %s1543_s27 = sld [smem:[#allocation2 + $0x78]]  ;;  %s1653_s28 = sld [smem:[#allocation2 + $0xbb]] }
  0x6a   :  { %v466_v38 = vmax.f32 %v465_v30, 0.0  ;;  %v509_v41 = vstv %s1450_s30  ;;  %v447_v42 = vadd.f32 %v446_v34, %v424_v22  ;;  %v502_v45 = vmul.f32 %v1027_v1, %v501_v39  ;;  %v1556_v22 = vld [vmem:[%s1743_s0 + $0x3] sm:$0x1]  ;;  %s1655_s29 = sld [smem:[#allocation2 + $0xbc]]  ;;  %s1660_s30 = sld [smem:[#allocation2 + $0x1d]] }
  0x6b   :  { %v484_v43 = vadd.f32 %v483_v28, %v480_v35  ;;  %v499_v44 = vadd.f32 %v498_v37, %v496_v36  ;;  %v491_v47 = vstv %s1457_s14  ;;  %v506_v48 = vmul.f32 %v1036_v2, %v505_v40  ;;  %s1662_s14 = sld [smem:[#allocation2 + $0x9d]] }
  0x6c   :  { %v469_v46 = vmul.f32 %v468_v31, %v466_v38  ;;  %v510_v49 = vmul.f32 %v1045_v4, %v509_v41  ;;  %v518_v52 = vstv %s1464_s4  ;;  %v521_v53 = vstv %s1466_s5  ;;  %s1562_s4 = sld [smem:[#allocation2 + $0xb8]]  ;;  %s1675_s5 = sld [smem:[#allocation2 + $0x7d]] }
  0x6d   :  { %v488_v50 = vadd.f32 %v487_v32, %v484_v43  ;;  %v503_v51 = vadd.f32 %v502_v45, %v499_v44  ;;  %v514_v54 = vstv %s1459_s3  ;;  %v519_v55 = vmul.f32 %v518_v52, %v1018_v0  ;;  %s1560_s3 = sld [smem:[#allocation2 + $0xb7]] }
  0x6e   :  { %v524_v56 = vstv %s1470_s6  ;;  %v528_v57 = vstv %s1472_s7  ;;  %v470_v58 = vadd.f32 %v469_v46, %v447_v42  ;;  %v532_v3 = vstv %s1479_s8  ;;  %s1572_s7 = sld [smem:[#allocation2 + $0x19]]  ;;  %s1677_s6 = sld [smem:[#allocation2 + $0x1e]] }
  0x6f   :  { %v489_v59 = vmax.f32 %v488_v50, 0.0  ;;  %v507_v60 = vadd.f32 %v506_v48, %v503_v51  ;;  %v525_v61 = vmul.f32 %v1027_v1, %v524_v56  ;;  %v522_v62 = vadd.f32 %v521_v53, %v519_v55  ;;  %s1574_s8 = sld [smem:[#allocation2 + $0x99]] }
  0x70   :  { %v529_v63 = vmul.f32 %v1036_v2, %v528_v57  ;;  %v541_v5 = vstv %s1481_s9  ;;  %v533_v8 = vmul.f32 %v1045_v4, %v532_v3  ;;  %v544_v10 = vstv %s1485_s10  ;;  %s1578_s9 = sld [smem:[#allocation2 + $0x39]] }
  0x71   :  { %v492_v6 = vmul.f32 %v491_v47, %v489_v59  ;;  %v511_v7 = vadd.f32 %v510_v49, %v507_v60  ;;  %v542_v9 = vmul.f32 %v541_v5, %v1018_v0  ;;  %v526_v1 = vadd.f32 %v525_v61, %v522_v62  ;;  %v1538_v0 = vld [vmem:[%s1743_s0 + $0x1] sm:$0x1]  ;;  %s1580_s0 = sld [smem:[#allocation2 + $0x59]] }
  0x72   :  { %v547_v11 = vstv %s1490_s11  ;;  %v551_v2 = vstv %s1492_s12  ;;  %v537_v16 = vstv %s1498_s13  ;;  %v555_v19 = vstv %s1500_s15  ;;  %s1587_s10 = sld [smem:[#allocation2 + $0x79]]  ;;  %s1589_s11 = sld [smem:[#allocation2 + $0x1a]] }
  0x73   :  { %v493_v12 = vadd.f32 %v492_v6, %v470_v58  ;;  %v512_v13 = vmax.f32 %v511_v7, 0.0  ;;  %v545_v4 = vadd.f32 %v544_v10, %v542_v9  ;;  %v548_v14 = vmul.f32 %v1538_v0, %v547_v11  ;;  %s1593_s12 = sld [smem:[#allocation2 + $0x9a]] }
  0x74   :  { %v530_v15 = vadd.f32 %v529_v63, %v526_v1  ;;  %v552_v18 = vmul.f32 %v1549_v17, %v551_v2  ;;  %v556_v23 = vmul.f32 %v1556_v22, %v555_v19  ;;  %v564_v24 = vstv %s1504_s16  ;;  %s1598_s13 = sld [smem:[#allocation2 + $0x3a]]  ;;  %s1606_s16 = sld [smem:[#allocation2 + $0xb9]] }
  0x75   :  { %v515_v20 = vmul.f32 %v514_v54, %v512_v13  ;;  %v549_v21 = vadd.f32 %v548_v14, %v545_v4  ;;  %v565_v27 = vmul.f32 %v1567_v26, %v564_v24  ;;  %v567_v28 = vstv %s1510_s17  ;;  %s1600_s15 = sld [smem:[#allocation2 + $0x5a]] }
  0x76   :  { %v534_v25 = vadd.f32 %v533_v8, %v530_v15  ;;  %v570_v29 = vstv %s1512_s18  ;;  %v574_v33 = vstv %s1515_s1  ;;  %v578_v37 = vstv %s1520_s19  ;;  %s1608_s17 = sld [smem:[#allocation2 + $0x7a]]  ;;  %s1612_s18 = sld [smem:[#allocation2 + $0x1b]] }
  0x77   :  { %v516_v30 = vadd.f32 %v515_v20, %v493_v12  ;;  %v553_v31 = vadd.f32 %v552_v18, %v549_v21  ;;  %v571_v32 = vmul.f32 %v1538_v0, %v570_v29  ;;  %v568_v35 = vadd.f32 %v567_v28, %v565_v27  ;;  %s1618_s1 = sld [smem:[#allocation2 + $0x9b]] }
  0x78   :  { %v535_v34 = vmax.f32 %v534_v25, 0.0  ;;  %v575_v36 = vmul.f32 %v1549_v17, %v574_v33  ;;  %v560_v39 = vstv %s1524_s20  ;;  %v579_v40 = vmul.f32 %v1556_v22, %v578_v37  ;;  %s1620_s19 = sld [smem:[#allocation2 + $0x3b]] }
  0x79   :  { %v557_v38 = vadd.f32 %v556_v23, %v553_v31  ;;  %v587_v41 = vstv %s1526_s21  ;;  %v572_v43 = vadd.f32 %v571_v32, %v568_v35  ;;  %v590_v45 = vstv %s1531_s22  ;;  %s1623_s20 = sld [smem:[#allocation2 + $0x5b]]  ;;  %s1632_s22 = sld [smem:[#allocation2 + $0xba]] }
  0x7a   :  { %v538_v42 = vmul.f32 %v537_v16, %v535_v34  ;;  %v588_v44 = vmul.f32 %v1567_v26, %v587_v41  ;;  %v593_v47 = vstv %s1533_s23  ;;  %v597_v48 = vstv %s1541_s26  ;;  %s1628_s21 = sld [smem:[#allocation2 + $0x7b]]  ;;  %s1634_s23 = sld [smem:[#allocation2 + $0x1c]] }
  0x7b   :  { %v558_v46 = vmax.f32 %v557_v38, 0.0  ;;  %v601_v49 = vstv %s1543_s27  ;;  %v576_v51 = vadd.f32 %v575_v36, %v572_v43  ;;  %v594_v53 = vmul.f32 %v1538_v0, %v593_v47  ;;  %s1644_s26 = sld [smem:[#allocation2 + $0x5c]] }
  0x7c   :  { %v539_v50 = vadd.f32 %v538_v42, %v516_v30  ;;  %v591_v52 = vadd.f32 %v590_v45, %v588_v44  ;;  %v583_v55 = vstv %s1560_s3  ;;  %v598_v56 = vmul.f32 %v1549_v17, %v597_v48  ;;  %s1646_s27 = sld [smem:[#allocation2 + $0x7c]]  ;;  %s1666_s3 = sld [smem:[#allocation2 + $0x3d]] }
  0x7d   :  { %v561_v54 = vmul.f32 %v560_v39, %v558_v46  ;;  %v602_v57 = vmul.f32 %v1556_v22, %v601_v49  ;;  %v580_v58 = vadd.f32 %v579_v40, %v576_v51  ;;  %v610_v60 = vstv %s1572_s7  ;;  %s1681_s7 = sld [smem:[#allocation2 + $0x9e]] }
  0x7e   :  { %v595_v59 = vadd.f32 %v594_v53, %v591_v52  ;;  %v613_v61 = vstv %s1574_s8  ;;  %v606_v62 = vstv %s1562_s4  ;;  %v611_v63 = vmul.f32 %v1567_v26, %v610_v60  ;;  %s1668_s4 = sld [smem:[#allocation2 + $0x5d]]  ;;  %s1686_s8 = sld [smem:[#allocation2 + $0x3e]] }
  0x7f   :  { %v616_v3 = vstv %s1578_s9  ;;  %v620_v5 = vstv %s1580_s0  ;;  %v562_v6 = vadd.f32 %v561_v54, %v539_v50  ;;  %v581_v7 = vmax.f32 %v580_v58, 0.0  ;;  %s1688_s9 = sld [smem:[#allocation2 + $0x5e]]  ;;  %s1694_s0 = sld [smem:[#allocation2 + $0xbd]] }
  0x80   :  { %v599_v8 = vadd.f32 %v598_v56, %v595_v59  ;;  %v617_v9 = vmul.f32 %v1538_v0, %v616_v3  ;;  %v614_v1 = vadd.f32 %v613_v61, %v611_v63  ;;  %v621_v10 = vmul.f32 %v1549_v17, %v620_v5 }
  0x81   :  { %v624_v11 = vstv %s1587_s10  ;;  %v633_v2 = vstv %s1589_s11  ;;  %v584_v12 = vmul.f32 %v583_v55, %v581_v7  ;;  %v636_v16 = vstv %s1593_s12  ;;  %s1696_s10 = sld [smem:[#allocation2 + $0x7e]]  ;;  %s1700_s11 = sld [smem:[#allocation2 + $0x1f]] }
  0x82   :  { %v603_v13 = vadd.f32 %v602_v57, %v599_v8  ;;  %v625_v4 = vmul.f32 %v1556_v22, %v624_v11  ;;  %v634_v14 = vmul.f32 %v1567_v26, %v633_v2  ;;  %v618_v15 = vadd.f32 %v617_v9, %v614_v1  ;;  %s1706_s12 = sld [smem:[#allocation2 + $0x9f]] }
  0x83   :  { %v639_v18 = vstv %s1598_s13  ;;  %v643_v19 = vstv %s1600_s15  ;;  %v585_v20 = vadd.f32 %v584_v12, %v562_v6  ;;  %v629_v27 = vstv %s1606_s16  ;;  %s1708_s13 = sld [smem:[#allocation2 + $0x3f]] }
  0x84   :  { %v604_v21 = vmax.f32 %v603_v13, 0.0  ;;  %v637_v23 = vadd.f32 %v636_v16, %v634_v14  ;;  %v640_v24 = vmul.f32 %v1538_v0, %v639_v18  ;;  %v622_v25 = vadd.f32 %v621_v10, %v618_v15  ;;  %s1711_s15 = sld [smem:[#allocation2 + $0x5f]] }
  0x85   :  { %v644_v28 = vmul.f32 %v1549_v17, %v643_v19  ;;  %v647_v29 = vstv %s1608_s17  ;;  %v656_v33 = vstv %s1612_s18  ;;  %v659_v36 = vstv %s1618_s1  ;;  %s1716_s16 = sld [smem:[#allocation2 + $0x7f]]  ;;  %s1723_s17 = sld [smem:[#allocation2 + $0xbe]] }
  0x86   :  { %v607_v30 = vmul.f32 %v606_v62, %v604_v21  ;;  %v641_v31 = vadd.f32 %v640_v24, %v637_v23  ;;  %v648_v32 = vmul.f32 %v1556_v22, %v647_v29  ;;  %v626_v34 = vadd.f32 %v625_v4, %v622_v25  ;;  %s970_s18 = sld [smem:[#allocation2 + $0xbf]] }
  0x87   :  { %v657_v35 = vmul.f32 %v1567_v26, %v656_v33  ;;  %v662_v37 = vstv %s1620_s19  ;;  %v666_v41 = vstv %s1623_s20  ;;  %v670_v45 = vstv %s1628_s21 }
  0x88   :  { %v608_v38 = vadd.f32 %v607_v30, %v585_v20  ;;  %v645_v39 = vadd.f32 %v644_v28, %v641_v31  ;;  %v663_v40 = vmul.f32 %v1538_v0, %v662_v37  ;;  %v627_v42 = vmax.f32 %v626_v34, 0.0 }
  0x89   :  { %v660_v43 = vadd.f32 %v659_v36, %v657_v35  ;;  %v667_v44 = vmul.f32 %v1549_v17, %v666_v41  ;;  %v652_v47 = vstv %s1632_s22  ;;  %v671_v48 = vmul.f32 %v1556_v22, %v670_v45 }
  0x8a   :  { %v649_v46 = vadd.f32 %v648_v32, %v645_v39  ;;  %v679_v49 = vstv %s1634_s23  ;;  %v630_v50 = vmul.f32 %v629_v27, %v627_v42  ;;  %v682_v53 = vstv %s1639_s24 }
  0x8b   :  { %v664_v51 = vadd.f32 %v663_v40, %v660_v43  ;;  %v680_v52 = vmul.f32 %v1567_v26, %v679_v49  ;;  %v685_v55 = vstv %s1641_s25  ;;  %v689_v56 = vstv %s1644_s26 }
  0x8c   :  { %v650_v54 = vmax.f32 %v649_v46, 0.0  ;;  %v693_v57 = vstv %s1646_s27  ;;  %v631_v58 = vadd.f32 %v630_v50, %v608_v38  ;;  %v686_v61 = vmul.f32 %v1538_v0, %v685_v55 }
  0x8d   :  { %v668_v59 = vadd.f32 %v667_v44, %v664_v51  ;;  %v683_v60 = vadd.f32 %v682_v53, %v680_v52  ;;  %v675_v63 = vstv %s1653_s28  ;;  %v690_v3 = vmul.f32 %v1549_v17, %v689_v56 }
  0x8e   :  { %v653_v62 = vmul.f32 %v652_v47, %v650_v54  ;;  %v694_v5 = vmul.f32 %v1556_v22, %v693_v57  ;;  %v702_v8 = vstv %s1660_s30  ;;  %v705_v9 = vstv %s1662_s14 }
  0x8f   :  { %v672_v6 = vadd.f32 %v671_v48, %v668_v59  ;;  %v687_v7 = vadd.f32 %v686_v61, %v683_v60  ;;  %v698_v1 = vstv %s1655_s29  ;;  %v703_v10 = vmul.f32 %v1567_v26, %v702_v8 }
  0x90   :  { %v708_v11 = vstv %s1666_s3  ;;  %v712_v2 = vstv %s1668_s4  ;;  %v654_v12 = vadd.f32 %v653_v62, %v631_v58  ;;  %v716_v18 = vstv %s1675_s5 }
  0x91   :  { %v673_v13 = vmax.f32 %v672_v6, 0.0  ;;  %v691_v4 = vadd.f32 %v690_v3, %v687_v7  ;;  %v709_v14 = vmul.f32 %v1538_v0, %v708_v11  ;;  %v706_v15 = vadd.f32 %v705_v9, %v703_v10 }
  0x92   :  { %v713_v16 = vmul.f32 %v1549_v17, %v712_v2  ;;  %v725_v19 = vstv %s1677_s6  ;;  %v717_v23 = vmul.f32 %v1556_v22, %v716_v18  ;;  %v728_v27 = vstv %s1681_s7 }
  0x93   :  { %v676_v20 = vmul.f32 %v675_v63, %v673_v13  ;;  %v695_v21 = vadd.f32 %v694_v5, %v691_v4  ;;  %v726_v24 = vmul.f32 %v1567_v26, %v725_v19  ;;  %v710_v25 = vadd.f32 %v709_v14, %v706_v15 }
  0x94   :  { %v731_v28 = vstv %s1686_s8  ;;  %v735_v29 = vstv %s1688_s9  ;;  %v721_v35 = vstv %s1694_s0  ;;  %v739_v37 = vstv %s1696_s10 }
  0x95   :  { %v677_v30 = vadd.f32 %v676_v20, %v654_v12  ;;  %v696_v31 = vmax.f32 %v695_v21, 0.0  ;;  %v729_v32 = vadd.f32 %v728_v27, %v726_v24  ;;  %v732_v33 = vmul.f32 %v1538_v0, %v731_v28 }
  0x96   :  { %v714_v34 = vadd.f32 %v713_v16, %v710_v25  ;;  %v736_v36 = vmul.f32 %v1549_v17, %v735_v29  ;;  %v740_v40 = vmul.f32 %v1556_v22, %v739_v37  ;;  %v748_v41 = vstv %s1700_s11 }
  0x97   :  { %v699_v38 = vmul.f32 %v698_v1, %v696_v31  ;;  %v733_v39 = vadd.f32 %v732_v33, %v729_v32  ;;  %v749_v43 = vmul.f32 %v1567_v26, %v748_v41  ;;  %v751_v44 = vstv %s1706_s12 }
  0x98   :  { %v718_v42 = vadd.f32 %v717_v23, %v714_v34  ;;  %v754_v45 = vstv %s1708_s13  ;;  %v758_v49 = vstv %s1711_s15  ;;  %v762_v53 = vstv %s1716_s16 }
  0x99   :  { %v700_v46 = vadd.f32 %v699_v38, %v677_v30  ;;  %v737_v47 = vadd.f32 %v736_v36, %v733_v39  ;;  %v755_v48 = vmul.f32 %v1538_v0, %v754_v45  ;;  %v752_v51 = vadd.f32 %v751_v44, %v749_v43 }
  0x9a   :  { %v719_v50 = vmax.f32 %v718_v42, 0.0  ;;  %v759_v52 = vmul.f32 %v1549_v17, %v758_v49  ;;  %v744_v56 = vstv %s1723_s17  ;;  %v763_v58 = vmul.f32 %v1556_v22, %v762_v53 }
  0x9b   :  { %v741_v54 = vadd.f32 %v740_v40, %v737_v47  ;;  %v756_v57 = vadd.f32 %v755_v48, %v752_v51  ;;  %v767_v63 = vstv %s970_s18 }
  0x9c   :  { %v722_v55 = vmul.f32 %v721_v35, %v719_v50 }
  0x9d   :  { %v742_v26 = vmax.f32 %v741_v54, 0.0  ;;  %v760_v60 = vadd.f32 %v759_v52, %v756_v57 }
  0x9e   :  { %v723_v59 = vadd.f32 %v722_v55, %v700_v46 }
  0x9f   :  { %v745_v61 = vmul.f32 %v744_v56, %v742_v26  ;;  %v764_v62 = vadd.f32 %v763_v58, %v760_v60 }
  0xa1   :  { %v746_v0 = vadd.f32 %v745_v61, %v723_v59  ;;  %v765_v3 = vmax.f32 %v764_v62, 0.0 }
  0xa3   :  { %v768_v5 = vmul.f32 %v767_v63, %v765_v3 }
  0xa5   :  { %v769_v6 = vadd.f32 %v768_v5, %v746_v0 }
  0xa7   :  { %770 = vst [vmem:[%s1745_s2] sm:$0x1] %v769_v6 }
  0xa8   :  { %775 = vsyncpa [#allocation3], 1 }

</bundles_post_ra>
